<compile_context>
chip_gen: v7x
topology: tpu7x:2x2x1
jax: 0.10.0
libtpu: 0.0.40
codegen_flags: <defaults>
</compile_context>

<pallas_src>
import numpy as np
import jax
import jax.numpy as jnp
from jax.experimental import pallas as pl
from jax.experimental.pallas import tpu as pltpu

# ----------------------------- problem sizes --------------------------------
BATCH = 128            # rows per kernel call (>=128 to fill an MXU pass)
OBS_DIM = 32           # obs_shape = (32,) -> identity encoder feature_dim
HIDDEN = 32            # hidden_dim
ACT_DIM = 4            # action_shape = (4,)
LOG_STD_MIN = -10.0
LOG_STD_MAX = 2.0

LANES = 128            # TPU lane width; all padded buffers are 128 lanes wide
BATCH_TILE = 128       # batch rows per grid step when B > 128

# Packed parameter slab layout (rows of the (SLAB_ROWS, 128) bf16 buffer).
R_W1 = 0                        # rows [0,32)    : W1 (OBS_DIM x HIDDEN, lane-padded)
R_W2 = R_W1 + OBS_DIM           # rows [32,160)  : W2 (zero-padded to 128 x 128)
R_W3 = R_W2 + LANES             # rows [160,288) : W3 (zero-padded to 128 x 128)
R_B = R_W3 + LANES              # rows 288/289/290 : b1 / b2 / b3
SLAB_ROWS = R_B + 16            # 304 (multiple of 16 -> bf16 sublane-tile aligned)

# Packed output lane offsets inside the (B, 128) f32 result.
O_MU = 0
O_PI = ACT_DIM
O_LS = 2 * ACT_DIM
O_LP = 3 * ACT_DIM              # single lane (log_pi)


# ----------------------- Pallas kernel: full Actor forward ------------------
def actor_kernel(obs_ref, noise_ref, w_ref, out_ref):
    f32, bf16 = jnp.float32, jnp.bfloat16
    A = ACT_DIM

    x = obs_ref[...].astype(bf16)                         # (B, OBS_DIM)

    # Static, tile-aligned views into the packed parameter slab (one DMA'd input).
    w1 = w_ref[R_W1:R_W1 + OBS_DIM, :]                    # (OBS_DIM, 128) bf16
    w2 = w_ref[R_W2:R_W2 + LANES, :]                      # (128, 128)     bf16
    w3 = w_ref[R_W3:R_W3 + LANES, :]                      # (128, 128)     bf16
    b_all = w_ref[R_B:R_B + 16, :].astype(f32)            # aligned (16,128) load
    b1, b2, b3 = b_all[0:1, :], b_all[1:2, :], b_all[2:3, :]

    # trunk: Linear -> ReLU -> Linear -> ReLU -> Linear (bf16 MXU, f32 accumulate).
    # Padded weight columns/rows are exact zeros, so the padded lanes stay 0.
    h1 = jnp.maximum(jnp.dot(x, w1, preferred_element_type=f32) + b1, 0.0)
    h2 = jnp.maximum(jnp.dot(h1.astype(bf16), w2, preferred_element_type=f32) + b2, 0.0)
    out = jnp.dot(h2.astype(bf16), w3, preferred_element_type=f32) + b3   # (B, 128)

    mu = out[:, 0:A]                                      # chunk(2, dim=-1)
    log_std = out[:, A:2 * A]

    # log_std squashing into [log_std_min, log_std_max]  (f32 tail everywhere)
    log_std = jnp.tanh(log_std)
    log_std = LOG_STD_MIN + 0.5 * (LOG_STD_MAX - LOG_STD_MIN) * (log_std + 1.0)

    # reparameterized sample (compute_pi=True)
    std = jnp.exp(log_std)
    noise = noise_ref[...]
    pi = mu + noise * std

    # gaussian_logprob (compute_log_pi=True)
    residual = jnp.sum(-0.5 * noise * noise - log_std, axis=-1, keepdims=True)
    log_pi = residual - 0.5 * np.log(2.0 * np.pi) * float(A)

    # squash
    mu_t = jnp.tanh(mu)
    pi_t = jnp.tanh(pi)
    log_pi = log_pi - jnp.sum(
        jnp.log(jnp.maximum(1.0 - pi_t * pi_t, 0.0) + 1e-6),
        axis=-1, keepdims=True)

    # Single lane-dense (B, 128) output tile -> one dense HBM writeback DMA.
    out_ref[...] = jnp.zeros_like(out_ref)
    out_ref[:, O_MU:O_MU + A] = mu_t
    out_ref[:, O_PI:O_PI + A] = pi_t
    out_ref[:, O_LS:O_LS + A] = log_std
    out_ref[:, O_LP:O_LP + 1] = log_pi


def actor_forward(obs, noise, w_slab):
    """obs: (B, OBS_DIM) f32, noise: (B, ACT_DIM) f32, w_slab: (SLAB_ROWS,128) bf16."""
    B = obs.shape[0]
    out_shape = jax.ShapeDtypeStruct((B, LANES), jnp.float32)

    if B <= BATCH_TILE:
        # No grid: single invocation, whole arrays resident in VMEM, no pipeline
        # prologue/epilogue or double-buffering overhead.
        packed = pl.pallas_call(actor_kernel, out_shape=out_shape)(obs, noise, w_slab)
    else:
        # Batch grid axis marked "parallel" so v7x can shard rows across its two
        # TensorCores; the weight slab's block index is constant -> stays resident.
        assert B % BATCH_TILE == 0
        packed = pl.pallas_call(
            actor_kernel,
            out_shape=out_shape,
            grid=(B // BATCH_TILE,),
            in_specs=[
                pl.BlockSpec((BATCH_TILE, OBS_DIM), lambda i: (i, 0)),
                pl.BlockSpec((BATCH_TILE, ACT_DIM), lambda i: (i, 0)),
                pl.BlockSpec((SLAB_ROWS, LANES), lambda i: (0, 0)),
            ],
            out_specs=pl.BlockSpec((BATCH_TILE, LANES), lambda i: (i, 0)),
            compiler_params=pltpu.CompilerParams(
                dimension_semantics=("parallel",)),
        )(obs, noise, w_slab)

    A = ACT_DIM
    mu = packed[:, O_MU:O_MU + A]
    pi = packed[:, O_PI:O_PI + A]
    log_std = packed[:, O_LS:O_LS + A]
    log_pi = packed[:, O_LP:O_LP + 1]
    return mu, pi, log_pi, log_std


# ----------------------- deterministic parameter init -----------------------
def orthogonal(key, fan_in, fan_out):
    """Orthogonal init (like nn.init.orthogonal_), returned as (fan_in, fan_out)."""
    n, m = fan_in, fan_out
    a = np.asarray(jax.random.normal(key, (max(n, m), min(n, m)), dtype=jnp.float32))
    q, r = np.linalg.qr(a)
    q = q * np.sign(np.diag(r))
    if n < m:
        q = q.T
    return jnp.asarray(q[:n, :m], dtype=jnp.float32)


def make_params(key):
    k1, k2, k3, kb = jax.random.split(key, 4)
    w1 = orthogonal(k1, OBS_DIM, HIDDEN)        # stored (fan_in, fan_out): y = x @ W + b
    w2 = orthogonal(k2, HIDDEN, HIDDEN)
    w3 = orthogonal(k3, HIDDEN, 2 * ACT_DIM)
    # weight_init fills biases with 0; use small nonzero values here so the
    # kernel's bias path is actually exercised by the correctness check.
    kb1, kb2, kb3 = jax.random.split(kb, 3)
    b1 = 0.01 * jax.random.normal(kb1, (HIDDEN,), jnp.float32)
    b2 = 0.01 * jax.random.normal(kb2, (HIDDEN,), jnp.float32)
    b3 = 0.01 * jax.random.normal(kb3, (2 * ACT_DIM,), jnp.float32)
    return (w1, b1, w2, b2, w3, b3)


def pack_params(params):
    """Concatenate all weights/biases into one lane-dense bf16 slab (single DMA)."""
    w1, b1, w2, b2, w3, b3 = (np.asarray(p, np.float32) for p in params)
    slab = np.zeros((SLAB_ROWS, LANES), np.float32)
    slab[R_W1:R_W1 + OBS_DIM, :HIDDEN] = w1
    slab[R_W2:R_W2 + HIDDEN, :HIDDEN] = w2
    slab[R_W3:R_W3 + HIDDEN, :2 * ACT_DIM] = w3
    slab[R_B + 0, :HIDDEN] = b1
    slab[R_B + 1, :HIDDEN] = b2
    slab[R_B + 2, :2 * ACT_DIM] = b3
    return jnp.asarray(slab, dtype=jnp.bfloat16)


# ----------------------- pure-JAX reference for verification ----------------
def actor_reference(obs, noise, params):
    """Mirrors the kernel's dtype strategy exactly (bf16 matmuls, f32 tail)."""
    w1, b1, w2, b2, w3, b3 = params
    f32, bf16 = jnp.float32, jnp.bfloat16

    def linear(x, w, b):
        return (jnp.dot(x.astype(bf16), w.astype(bf16), preferred_element_type=f32)
                + b.astype(bf16).astype(f32))

    h = jnp.maximum(linear(obs, w1, b1), 0.0)
    h = jnp.maximum(linear(h, w2, b2), 0.0)
    out = linear(h, w3, b3)
    mu, log_std = out[:, :ACT_DIM], out[:, ACT_DIM:]
    log_std = jnp.tanh(log_std)
    log_std = LOG_STD_MIN + 0.5 * (LOG_STD_MAX - LOG_STD_MIN) * (log_std + 1.0)
    std = jnp.exp(log_std)
    pi = mu + noise * std
    residual = jnp.sum(-0.5 * noise ** 2 - log_std, axis=-1, keepdims=True)
    log_pi = residual - 0.5 * np.log(2.0 * np.pi) * ACT_DIM
    mu_t, pi_t = jnp.tanh(mu), jnp.tanh(pi)
    log_pi = log_pi - jnp.sum(
        jnp.log(jnp.maximum(1.0 - pi_t ** 2, 0.0) + 1e-6), axis=-1, keepdims=True)
    return mu_t, pi_t, log_pi, log_std


if __name__ == "__main__":
    key = jax.random.PRNGKey(0)
    k_obs, k_noise, k_param = jax.random.split(key, 3)

    params = make_params(k_param)
    w_slab = pack_params(params)

    # log_pi flows through log(relu(1 - tanh(pi)^2) + 1e-6) and a sum of
    # 6x-amplified tanh terms, which is ill-conditioned near saturation -> it
    # gets a looser tolerance than the bounded tanh outputs.
    tols = {"mu": (5e-3, 5e-3), "pi": (5e-3, 5e-3),
            "log_pi": (2e-2, 1e-1), "log_std": (5e-3, 2e-2)}

    # Exercise both the no-grid single-block path (B=128) and the batch-gridded
    # path (B=256) that shards rows across v7x's two TensorCores.
    for B in (BATCH, 2 * BATCH_TILE):
        obs = 0.5 * jax.random.normal(k_obs, (B, OBS_DIM), dtype=jnp.float32)
        noise = jax.random.normal(k_noise, (B, ACT_DIM), dtype=jnp.float32)  # randn_like(mu)

        outs = jax.block_until_ready(actor_forward(obs, noise, w_slab))
        refs = actor_reference(obs, noise, params)

        for name, o, r in zip(("mu", "pi", "log_pi", "log_std"), outs, refs):
            rtol, atol = tols[name]
            np.testing.assert_allclose(np.asarray(o), np.asarray(r),
                                       rtol=rtol, atol=atol, err_msg=name)

    print("KERNEL_OK")
</pallas_src>

<mosaic_0001>
module attributes {stable_mosaic.version = 11 : i64} {
  func.func @actor_kernel(%arg0: memref<128x32xf32, #tpu.memory_space<vmem>>, %arg1: memref<128x4xf32, #tpu.memory_space<vmem>>, %arg2: memref<304x128xbf16, #tpu.memory_space<vmem>>, %arg3: memref<128x128xf32, #tpu.memory_space<vmem>>) attributes {dimension_semantics = [], scalar_prefetch = 0 : i64, scratch_operands = 0 : i64, tpu.core_type = #tpu.core_type<tc>} {
    %c0 = arith.constant 0 : index
    %c0_0 = arith.constant 0 : index
    %0 = vector.load %arg0[%c0, %c0_0] : memref<128x32xf32, #tpu.memory_space<vmem>>, vector<128x32xf32>
    %1 = arith.truncf %0 : vector<128x32xf32> to vector<128x32xbf16>
    %c0_1 = arith.constant 0 : index
    %c0_2 = arith.constant 0 : index
    %2 = vector.load %arg2[%c0_1, %c0_2] : memref<304x128xbf16, #tpu.memory_space<vmem>>, vector<32x128xbf16>
    %c32 = arith.constant 32 : index
    %c0_3 = arith.constant 0 : index
    %3 = vector.load %arg2[%c32, %c0_3] : memref<304x128xbf16, #tpu.memory_space<vmem>>, vector<128x128xbf16>
    %c160 = arith.constant 160 : index
    %c0_4 = arith.constant 0 : index
    %4 = vector.load %arg2[%c160, %c0_4] : memref<304x128xbf16, #tpu.memory_space<vmem>>, vector<128x128xbf16>
    %c288 = arith.constant 288 : index
    %c0_5 = arith.constant 0 : index
    %5 = vector.load %arg2[%c288, %c0_5] : memref<304x128xbf16, #tpu.memory_space<vmem>>, vector<16x128xbf16>
    %6 = arith.extf %5 : vector<16x128xbf16> to vector<16x128xf32>
    %7 = vector.extract_strided_slice %6 {offsets = [0, 0], sizes = [1, 128], strides = [1, 1]} : vector<16x128xf32> to vector<1x128xf32>
    %8 = vector.extract_strided_slice %6 {offsets = [1, 0], sizes = [1, 128], strides = [1, 1]} : vector<16x128xf32> to vector<1x128xf32>
    %9 = vector.extract_strided_slice %6 {offsets = [2, 0], sizes = [1, 128], strides = [1, 1]} : vector<16x128xf32> to vector<1x128xf32>
    %cst = arith.constant dense<0.000000e+00> : vector<128x128xf32>
    %10 = tpu.matmul %1, %2, %cst {dimension_numbers = #tpu.dot_dimension_numbers<[1], [0], [0], [1], [0, 0, 1, 1], [], []>} : vector<128x32xbf16>, vector<32x128xbf16>, vector<128x128xf32> -> vector<128x128xf32>
    %11 = vector.broadcast %7 : vector<1x128xf32> to vector<128x128xf32>
    %12 = arith.addf %10, %11 : vector<128x128xf32>
    %cst_6 = arith.constant 0.000000e+00 : f32
    %13 = vector.broadcast %cst_6 : f32 to vector<128x128xf32>
    %14 = arith.maximumf %12, %13 : vector<128x128xf32>
    %15 = arith.truncf %14 : vector<128x128xf32> to vector<128x128xbf16>
    %cst_7 = arith.constant dense<0.000000e+00> : vector<128x128xf32>
    %16 = tpu.matmul %15, %3, %cst_7 {dimension_numbers = #tpu.dot_dimension_numbers<[1], [0], [0], [1], [0, 0, 1, 1], [], []>} : vector<128x128xbf16>, vector<128x128xbf16>, vector<128x128xf32> -> vector<128x128xf32>
    %17 = vector.broadcast %8 : vector<1x128xf32> to vector<128x128xf32>
    %18 = arith.addf %16, %17 : vector<128x128xf32>
    %cst_8 = arith.constant 0.000000e+00 : f32
    %19 = vector.broadcast %cst_8 : f32 to vector<128x128xf32>
    %20 = arith.maximumf %18, %19 : vector<128x128xf32>
    %21 = arith.truncf %20 : vector<128x128xf32> to vector<128x128xbf16>
    %cst_9 = arith.constant dense<0.000000e+00> : vector<128x128xf32>
    %22 = tpu.matmul %21, %4, %cst_9 {dimension_numbers = #tpu.dot_dimension_numbers<[1], [0], [0], [1], [0, 0, 1, 1], [], []>} : vector<128x128xbf16>, vector<128x128xbf16>, vector<128x128xf32> -> vector<128x128xf32>
    %23 = vector.broadcast %9 : vector<1x128xf32> to vector<128x128xf32>
    %24 = arith.addf %22, %23 : vector<128x128xf32>
    %25 = vector.extract_strided_slice %24 {offsets = [0, 0], sizes = [128, 4], strides = [1, 1]} : vector<128x128xf32> to vector<128x4xf32>
    %26 = vector.extract_strided_slice %24 {offsets = [0, 4], sizes = [128, 4], strides = [1, 1]} : vector<128x128xf32> to vector<128x4xf32>
    %27 = math.tanh %26 : vector<128x4xf32>
    %cst_10 = arith.constant 1.000000e+00 : f32
    %28 = vector.broadcast %cst_10 : f32 to vector<128x4xf32>
    %29 = arith.addf %27, %28 : vector<128x4xf32>
    %cst_11 = arith.constant 6.000000e+00 : f32
    %30 = vector.broadcast %cst_11 : f32 to vector<128x4xf32>
    %31 = arith.mulf %30, %29 : vector<128x4xf32>
    %cst_12 = arith.constant -1.000000e+01 : f32
    %32 = vector.broadcast %cst_12 : f32 to vector<128x4xf32>
    %33 = arith.addf %32, %31 : vector<128x4xf32>
    %34 = math.exp %33 : vector<128x4xf32>
    %c0_13 = arith.constant 0 : index
    %c0_14 = arith.constant 0 : index
    %35 = vector.load %arg1[%c0_13, %c0_14] : memref<128x4xf32, #tpu.memory_space<vmem>>, vector<128x4xf32>
    %36 = arith.mulf %35, %34 : vector<128x4xf32>
    %37 = arith.addf %25, %36 : vector<128x4xf32>
    %cst_15 = arith.constant -5.000000e-01 : f32
    %38 = vector.broadcast %cst_15 : f32 to vector<128x4xf32>
    %39 = arith.mulf %38, %35 : vector<128x4xf32>
    %40 = arith.mulf %39, %35 : vector<128x4xf32>
    %41 = arith.subf %40, %33 : vector<128x4xf32>
    %cst_16 = arith.constant dense<0.000000e+00> : vector<128xf32>
    %42 = vector.multi_reduction <add>, %41, %cst_16 [1] : vector<128x4xf32> to vector<128xf32>
    %43 = vector.shape_cast %42 : vector<128xf32> to vector<128x1xf32>
    %cst_17 = arith.constant 3.67575407 : f32
    %44 = vector.broadcast %cst_17 : f32 to vector<128x1xf32>
    %45 = arith.subf %43, %44 : vector<128x1xf32>
    %46 = math.tanh %25 : vector<128x4xf32>
    %47 = math.tanh %37 : vector<128x4xf32>
    %48 = arith.mulf %47, %47 : vector<128x4xf32>
    %cst_18 = arith.constant 1.000000e+00 : f32
    %49 = vector.broadcast %cst_18 : f32 to vector<128x4xf32>
    %50 = arith.subf %49, %48 : vector<128x4xf32>
    %cst_19 = arith.constant 0.000000e+00 : f32
    %51 = vector.broadcast %cst_19 : f32 to vector<128x4xf32>
    %52 = arith.maximumf %50, %51 : vector<128x4xf32>
    %cst_20 = arith.constant 9.99999997E-7 : f32
    %53 = vector.broadcast %cst_20 : f32 to vector<128x4xf32>
    %54 = arith.addf %52, %53 : vector<128x4xf32>
    %55 = math.log %54 : vector<128x4xf32>
    %cst_21 = arith.constant dense<0.000000e+00> : vector<128xf32>
    %56 = vector.multi_reduction <add>, %55, %cst_21 [1] : vector<128x4xf32> to vector<128xf32>
    %57 = vector.shape_cast %56 : vector<128xf32> to vector<128x1xf32>
    %58 = arith.subf %45, %57 : vector<128x1xf32>
    %cst_22 = arith.constant 0.000000e+00 : f32
    %59 = vector.broadcast %cst_22 : f32 to vector<128x128xf32>
    %c0_23 = arith.constant 0 : index
    %c0_24 = arith.constant 0 : index
    %60 = vector.load %arg3[%c0_23, %c0_24] : memref<128x128xf32, #tpu.memory_space<vmem>>, vector<128x128xf32>
    tpu.vector_store %arg3[%c0_23, %c0_24], %59 {strides = array<i32>} : memref<128x128xf32, #tpu.memory_space<vmem>>, vector<128x128xf32>,
    %c0_25 = arith.constant 0 : index
    %c0_26 = arith.constant 0 : index
    %61 = vector.load %arg3[%c0_25, %c0_26] : memref<128x128xf32, #tpu.memory_space<vmem>>, vector<128x4xf32>
    tpu.vector_store %arg3[%c0_25, %c0_26], %46 {strides = array<i32>} : memref<128x128xf32, #tpu.memory_space<vmem>>, vector<128x4xf32>,
    %c0_27 = arith.constant 0 : index
    %c4 = arith.constant 4 : index
    %62 = vector.load %arg3[%c0_27, %c4] : memref<128x128xf32, #tpu.memory_space<vmem>>, vector<128x4xf32>
    tpu.vector_store %arg3[%c0_27, %c4], %47 {strides = array<i32>} : memref<128x128xf32, #tpu.memory_space<vmem>>, vector<128x4xf32>,
    %c0_28 = arith.constant 0 : index
    %c8 = arith.constant 8 : index
    %63 = vector.load %arg3[%c0_28, %c8] : memref<128x128xf32, #tpu.memory_space<vmem>>, vector<128x4xf32>
    tpu.vector_store %arg3[%c0_28, %c8], %33 {strides = array<i32>} : memref<128x128xf32, #tpu.memory_space<vmem>>, vector<128x4xf32>,
    %c0_29 = arith.constant 0 : index
    %c12 = arith.constant 12 : index
    %64 = vector.load %arg3[%c0_29, %c12] : memref<128x128xf32, #tpu.memory_space<vmem>>, vector<128x1xf32>
    tpu.vector_store %arg3[%c0_29, %c12], %58 {strides = array<i32>} : memref<128x128xf32, #tpu.memory_space<vmem>>, vector<128x1xf32>,
    return
  }
}

</mosaic_0001>

<bundles_post_ra>
// kernel: tpu_custom_call.1
= control target key start
LH: loop header
LB: loop body
LE: loop exit
PB: predicated region body
PF: predicated region fallthrough
CT: control target
= control target key end

     0   :  { %vm94_vm0 = vcmask 261120   ;;  %s2391_s0 = inlined_call_operand.vmem [shape: f32[128,32], index: 0, kind: input, shape index: {}]   ;;  %s2392_s1 = inlined_call_operand.vmem [shape: f32[128,4], index: 1, kind: input, shape index: {}]   ;;  %s2393_s2 = inlined_call_operand.vmem [shape: bf16[304,128], index: 2, kind: input, shape index: {}]   ;;  %s2394_s3 = inlined_call_operand.hbm [shape: f32[128,128], index: 3, kind: output, shape index: {}]  }
   0x1   :  { %v1508_v0 = vld [vmem:[%s2393_s2] sm:$0xff]   ;;  %v1509_v1 = vld [vmem:[%s2393_s2 + $0x8] sm:$0xff]   ;;  %v18_v5 = vld [vmem:[%s2391_s0 + $0x10] sm:$0xff] }
   0x2   :  { %1418 = vmatprep.subr.bf16.mxu0 %v1508_v0  ;;  %v16_v2 = vld [vmem:[%s2391_s0] sm:$0xff]  ;;  %v17_v3 = vld [vmem:[%s2391_s0 + $0x8] sm:$0xff]  ;;  %v19_v6 = vld [vmem:[%s2391_s0 + $0x18] sm:$0xff] }
   0x3   :  { %1419 = vmatpush3.bf16.msra.mxu0 %v1508_v0  ;;  %v32_v4 = vpack.c.bf16 %v17_v3, %v16_v2  ;;  %v20_v7 = vld [vmem:[%s2391_s0 + $0x20] sm:$0xff]  ;;  %v21_v8 = vld [vmem:[%s2391_s0 + $0x28] sm:$0xff]  ;;  %v33_v9 = vpack.c.bf16 %v19_v6, %v18_v5  ;;  %v1510_v11 = vld [vmem:[%s2393_s2 + $0x10] sm:$0xff]  }
   0x4   :  { %1420 = vmatprep.subr.bf16.mxu0 %v1509_v1  ;;  %v34_v10 = vpack.c.bf16 %v21_v8, %v20_v7  ;;  %v22_v12 = vld [vmem:[%s2391_s0 + $0x30] sm:$0xff]  ;;  %v23_v13 = vld [vmem:[%s2391_s0 + $0x38] sm:$0xff]  ;;  %v24_v15 = vld [vmem:[%s2391_s0 + $0x40] sm:$0xff]  ;;  %1438 = vmatprep.subr.bf16.mxu1 %v1510_v11 }
   0x5   :  { %1422 = vmatprep.mubr.msk.bf16.mxu0 %vm94_vm0, %v32_v4  ;;  %v1511_v14 = vld [vmem:[%s2393_s2 + $0x18] sm:$0xff]   ;;  %v25_v16 = vld [vmem:[%s2391_s0 + $0x48] sm:$0xff]  ;;  %1439 = vmatpush3.bf16.msra.mxu1 %v1510_v11  ;;  %v1512_v17 = vld [vmem:[%s2393_s2 + $0x20] sm:$0xff]   ;;  %v35_v18 = vpack.c.bf16 %v23_v13, %v22_v12 }
   0x6   :  { %1440 = vmatprep.subr.bf16.mxu1 %v1511_v14  ;;  %v1513_v19 = vld [vmem:[%s2393_s2 + $0x28] sm:$0xff]   ;;  %v36_v20 = vpack.c.bf16 %v25_v16, %v24_v15  ;;  %v26_v21 = vld [vmem:[%s2391_s0 + $0x50] sm:$0xff]  ;;  %v27_v22 = vld [vmem:[%s2391_s0 + $0x58] sm:$0xff] }
   0x7   :  { %1421 = vmatpush3.bf16.msra.mxu0 %v1509_v1  ;;  %v28_v23 = vld [vmem:[%s2391_s0 + $0x60] sm:$0xff]  ;;  %v29_v24 = vld [vmem:[%s2391_s0 + $0x68] sm:$0xff]  ;;  %v1514_v25 = vld [vmem:[%s2393_s2 + $0x30] sm:$0xff]  }
   0x9   :  { %1441 = vmatpush3.bf16.msra.mxu1 %v1511_v14 }
   0xa   :  { %1423 = vmatmul.mubr.msk.bf16.vlgmr.msra.gmra.mrb[0].mxu0 %vm94_vm0, %v33_v9  ;;  %1442 = vmatprep.subr.bf16.mxu1 %v1512_v17 }
   0xb   :  { %1426 = vmatprep.mubr.msk.bf16.mxu0 %vm94_vm0, %v34_v10 }
   0xd   :  { %1443 = vmatpush3.bf16.msra.mxu1 %v1512_v17 }
   0xe   :  { %1444 = vmatprep.subr.bf16.mxu1 %v1513_v19 }
  0x12   :  { %1427 = vmatmul.mubr.msk.bf16.gmra.mrb[4].mxu0 %vm94_vm0, %v35_v18 }
  0x13   :  { %1430 = vmatprep.mubr.msk.bf16.mxu0 %vm94_vm0, %v36_v20 }
  0x14   :  { %8 = vsyncpa [#allocation3], 0  ;;  %v37_v26 = vpack.c.bf16 %v27_v22, %v26_v21  ;;  %v38_v27 = vpack.c.bf16 %v29_v24, %v28_v23  ;;  %1445 = vmatpush3.bf16.msra.mxu1 %v1513_v19  ;;  %v1515_v28 = vld [vmem:[%s2393_s2 + $0x38] sm:$0xff]   ;;  %v30_v29 = vld [vmem:[%s2391_s0 + $0x70] sm:$0xff]  ;;  %v78_v40 = vlaneseq  ;;  %vm882_vm1 = vcmask 31744   ;;  %s1680_s27 = smov 4  }
  0x15   :  { %1446 = vmatprep.subr.bf16.mxu1 %v1514_v25  ;;  %v31_v30 = vld [vmem:[%s2391_s0 + $0x78] sm:$0xff]  ;;  %v1516_v32 = vld [vmem:[%s2393_s2 + $0x40] sm:$0xff]   ;;  %v1517_v33 = vld [vmem:[%s2393_s2 + $0x48] sm:$0xff]   ;;  %vm1219_vm2 = vcmask 64544   ;;  %vm1284_vm3 = vcmask 97344   ;;  %vm1301_vm4 = vcmask 105568  }
  0x16   :  { %v39_v31 = vpack.c.bf16 %v31_v30, %v30_v29  ;;  %v1518_v34 = vld [vmem:[%s2393_s2 + $0x50] sm:$0xff]   ;;  %v1519_v35 = vld [vmem:[%s2393_s2 + $0x58] sm:$0xff]   ;;  %v1520_v36 = vld [vmem:[%s2393_s2 + $0x60] sm:$0xff]   ;;  %v1808_v41 = vshrl.u32 %v78_v40, 7 }
  0x17   :  { %1470 = vmatprep.subr.bf16.mxu0 %v1518_v34  ;;  %v1521_v37 = vld [vmem:[%s2393_s2 + $0x68] sm:$0xff]   ;;  %v1522_v38 = vld [vmem:[%s2393_s2 + $0x70] sm:$0xff]   ;;  %v1523_v39 = vld [vmem:[%s2393_s2 + $0x78] sm:$0xff]  }
  0x18   :  { %1447 = vmatpush3.bf16.msra.mxu1 %v1514_v25  ;;  %1471 = vmatpush3.bf16.msra.mxu0 %v1518_v34  ;;  %v76_v42 = vld [vmem:[%s2393_s2 + $0x90] sm:$0xf]  ;;  %v80_v44 = vsub.s32 0, %v1808_v41  ;;  %v242_v40 = vsub.s32 1, %v1808_v41 }
  0x19   :  { %1448 = vmatprep.subr.bf16.mxu1 %v1515_v28  ;;  %1472 = vmatprep.subr.bf16.mxu0 %v1519_v35  ;;  %v1813_v43 = vunpack.c.l.bf16 %v76_v42 }
  0x1a   :  { %1431 = vmatmul.mubr.msk.bf16.gmra.mrb[8].mxu0 %vm94_vm0, %v37_v26 }
  0x1b   :  { %1434 = vmatprep.mubr.msk.bf16.mxu0 %vm94_vm0, %v38_v27  ;;  %v81_v45 = vrot.slane %v1813_v43, %v80_v44  ;;  %v243_v42 = vrot.slane %v1813_v43, %v242_v40 }
  0x1c   :  { %1449 = vmatpush3.bf16.msra.mxu1 %v1515_v28  ;;  %1473 = vmatpush3.bf16.msra.mxu0 %v1519_v35 }
  0x1d   :  { %1450 = vmatprep.subr.bf16.mxu1 %v1516_v32  ;;  %1474 = vmatprep.subr.bf16.mxu0 %v1520_v36 }
  0x20   :  { %1451 = vmatpush3.bf16.msra.mxu1 %v1516_v32  ;;  %1475 = vmatpush3.bf16.msra.mxu0 %v1520_v36 }
  0x21   :  { %1452 = vmatprep.subr.bf16.mxu1 %v1517_v33  ;;  %1476 = vmatprep.subr.bf16.mxu0 %v1521_v37 }
  0x22   :  { %1435 = vmatmul.mubr.msk.bf16.gmra.mrb[12].mxu0 %vm94_vm0, %v39_v31 }
  0x24   :  { %1453 = vmatpush3.bf16.msra.mxu1 %v1517_v33  ;;  %1477 = vmatpush3.bf16.msra.mxu0 %v1521_v37 }
  0x25   :  { %1478 = vmatprep.subr.bf16.mxu0 %v1522_v38 }
  0x28   :  { %1479 = vmatpush3.bf16.msra.mxu0 %v1522_v38  ;;  %v1524_v38 = vld [vmem:[%s2393_s2 + $0x80] sm:$0xff]  }
  0x29   :  { %1480 = vmatprep.subr.bf16.mxu0 %v1523_v39 }
  0x2c   :  { %1481 = vmatpush3.bf16.msra.mxu0 %v1523_v39  ;;  %v1525_v39 = vld [vmem:[%s2393_s2 + $0x88] sm:$0xff]   ;;  %s1679_s2 = smov 124  }
  0x2d   :  { %1482 = vmatprep.subr.bf16.mxu0 %v1524_v38 }
  0x30   :  { %1483 = vmatpush3.bf16.msra.mxu0 %v1524_v38 }
  0x31   :  { %1484 = vmatprep.subr.bf16.mxu0 %v1525_v39 }
  0x34   :  { %1485 = vmatpush3.bf16.msra.mxu0 %v1525_v39 }
  0xdd   :  { %v1424_v46 = vpop.f32.mrb[0].mxu0 }
  0xde   :  { %v162_v47 = vadd.f32 %v1424_v46, %v81_v45  ;;  %v153_v48 = vpop.f32.mrb[1].mxu0 }
  0xdf   :  { %v154_v49 = vadd.f32 %v153_v48, %v81_v45  ;;  %v1425_v50 = vpop.f32.mrb[2].mxu0 }
  0xe0   :  { %v165_v51 = vadd.f32 %v1425_v50, %v81_v45  ;;  %v156_v52 = vpop.f32.mrb[3].mxu0  ;;  %v218_v54 = vmax.f32 %v162_v47, 0.0 }
  0xe1   :  { %v157_v53 = vadd.f32 %v156_v52, %v81_v45  ;;  %v216_v56 = vmax.f32 %v154_v49, 0.0 }
  0xe2   :  { %v219_v55 = vmax.f32 %v165_v51, 0.0 }
  0xe3   :  { %v217_v57 = vmax.f32 %v157_v53, 0.0 }
  0xe4   :  { %v233_v58 = vpack.c.bf16 %v219_v55, %v218_v54 }
  0xe5   :  { %v1428_v59 = vpop.f32.mrb[4].mxu0  ;;  %v232_v60 = vpack.c.bf16 %v217_v57, %v216_v56 }
  0xe6   :  { %v178_v61 = vadd.f32 %v1428_v59, %v81_v45  ;;  %v169_v62 = vpop.f32.mrb[5].mxu0 }
  0xe7   :  { %v170_v63 = vadd.f32 %v169_v62, %v81_v45  ;;  %v1429_v0 = vpop.f32.mrb[6].mxu0  ;;  %1454 = vmatprep.mubr.bf16.mxu1 %v232_v60 }
  0xe8   :  { %v222_v1 = vmax.f32 %v178_v61, 0.0  ;;  %v181_v2 = vadd.f32 %v1429_v0, %v81_v45  ;;  %v172_v3 = vpop.f32.mrb[7].mxu0  ;;  %1455 = vmatmul.mubr.bf16.vlgmr.msra.gmra.mrb[0].mxu1 %v233_v58 }
  0xe9   :  { %v220_v4 = vmax.f32 %v170_v63, 0.0  ;;  %v173_v5 = vadd.f32 %v172_v3, %v81_v45 }
  0xea   :  { %v223_v6 = vmax.f32 %v181_v2, 0.0 }
  0xeb   :  { %v221_v7 = vmax.f32 %v173_v5, 0.0 }
  0xec   :  { %v235_v8 = vpack.c.bf16 %v223_v6, %v222_v1 }
  0xed   :  { %v234_v9 = vpack.c.bf16 %v221_v7, %v220_v4  ;;  %v1432_v10 = vpop.f32.mrb[8].mxu0 }
  0xee   :  { %v194_v11 = vadd.f32 %v1432_v10, %v81_v45  ;;  %v185_v12 = vpop.f32.mrb[9].mxu0 }
  0xef   :  { %1458 = vmatprep.mubr.bf16.mxu1 %v234_v9  ;;  %v186_v13 = vadd.f32 %v185_v12, %v81_v45  ;;  %v1433_v14 = vpop.f32.mrb[10].mxu0 }
  0xf0   :  { %1459 = vmatmul.mubr.bf16.gmra.mrb[4].mxu1 %v235_v8  ;;  %v226_v15 = vmax.f32 %v194_v11, 0.0  ;;  %v197_v16 = vadd.f32 %v1433_v14, %v81_v45  ;;  %v188_v17 = vpop.f32.mrb[11].mxu0 }
  0xf1   :  { %v224_v18 = vmax.f32 %v186_v13, 0.0  ;;  %v189_v19 = vadd.f32 %v188_v17, %v81_v45 }
  0xf2   :  { %v227_v20 = vmax.f32 %v197_v16, 0.0 }
  0xf3   :  { %v225_v21 = vmax.f32 %v189_v19, 0.0 }
  0xf4   :  { %v237_v22 = vpack.c.bf16 %v227_v20, %v226_v15 }
  0xf5   :  { %v236_v23 = vpack.c.bf16 %v225_v21, %v224_v18  ;;  %v1436_v24 = vpop.f32.mrb[12].mxu0 }
  0xf6   :  { %v210_v25 = vadd.f32 %v1436_v24, %v81_v45  ;;  %v201_v26 = vpop.f32.mrb[13].mxu0 }
  0xf7   :  { %1462 = vmatprep.mubr.bf16.mxu1 %v236_v23  ;;  %v202_v27 = vadd.f32 %v201_v26, %v81_v45  ;;  %v1437_v28 = vpop.f32.mrb[14].mxu0 }
  0xf8   :  { %1463 = vmatmul.mubr.bf16.gmra.mrb[8].mxu1 %v237_v22  ;;  %v230_v29 = vmax.f32 %v210_v25, 0.0  ;;  %v213_v30 = vadd.f32 %v1437_v28, %v81_v45  ;;  %v204_v31 = vpop.f32.mrb[15].mxu0 }
  0xf9   :  { %v228_v32 = vmax.f32 %v202_v27, 0.0  ;;  %v205_v33 = vadd.f32 %v204_v31, %v81_v45 }
  0xfa   :  { %v231_v34 = vmax.f32 %v213_v30, 0.0 }
  0xfb   :  { %v229_v35 = vmax.f32 %v205_v33, 0.0 }
  0xfc   :  { %v239_v36 = vpack.c.bf16 %v231_v34, %v230_v29 }
  0xfd   :  { %v238_v37 = vpack.c.bf16 %v229_v35, %v228_v32 }
  0xff   :  { %1466 = vmatprep.mubr.bf16.mxu1 %v238_v37  ;;  %v415_v37 = vsub.s32 2, %v1808_v41 }
 0x100   :  { %1467 = vmatmul.mubr.bf16.gmra.mrb[12].mxu1 %v239_v36  ;;  %v1678_v36 = vmov 0.0  }
 0x101   :  { %1125 = vst [vmem:[#allocation2 + $0x10] sm:$0xff] %v1678_v36  ;;  %1123 = vst [vmem:[#allocation2] sm:$0xff] %v1678_v36  ;;  %v1827_v38 = vrot.slane %v1813_v43, %v415_v37 }
 0x102   :  { %1124 = vst [vmem:[#allocation2 + $0x8] sm:$0xff] %v1678_v36  ;;  %1126 = vst [vmem:[#allocation2 + $0x18] sm:$0xff] %v1678_v36 }
 0x103   :  { %1127 = vst [vmem:[#allocation2 + $0x20] sm:$0xff] %v1678_v36  ;;  %1128 = vst [vmem:[#allocation2 + $0x28] sm:$0xff] %v1678_v36 }
 0x104   :  { %1129 = vst [vmem:[#allocation2 + $0x30] sm:$0xff] %v1678_v36  ;;  %1130 = vst [vmem:[#allocation2 + $0x38] sm:$0xff] %v1678_v36 }
 0x105   :  { %1131 = vst [vmem:[#allocation2 + $0x40] sm:$0xff] %v1678_v36  ;;  %1132 = vst [vmem:[#allocation2 + $0x48] sm:$0xff] %v1678_v36 }
 0x106   :  { %1133 = vst [vmem:[#allocation2 + $0x50] sm:$0xff] %v1678_v36  ;;  %1134 = vst [vmem:[#allocation2 + $0x58] sm:$0xff] %v1678_v36 }
 0x107   :  { %1135 = vst [vmem:[#allocation2 + $0x60] sm:$0xff] %v1678_v36  ;;  %1136 = vst [vmem:[#allocation2 + $0x68] sm:$0xff] %v1678_v36 }
 0x108   :  { %1137 = vst [vmem:[#allocation2 + $0x70] sm:$0xff] %v1678_v36  ;;  %1138 = vst [vmem:[#allocation2 + $0x78] sm:$0xff] %v1678_v36 }
 0x1bb   :  { %v1456_v44 = vpop.f32.mrb[0].mxu1 }
 0x1bc   :  { %v335_v45 = vadd.f32 %v1456_v44, %v243_v42  ;;  %v326_v46 = vpop.f32.mrb[1].mxu1 }
 0x1bd   :  { %v327_v47 = vadd.f32 %v326_v46, %v243_v42  ;;  %v1457_v48 = vpop.f32.mrb[2].mxu1 }
 0x1be   :  { %v338_v49 = vadd.f32 %v1457_v48, %v243_v42  ;;  %v329_v50 = vpop.f32.mrb[3].mxu1  ;;  %v391_v52 = vmax.f32 %v335_v45, 0.0 }
 0x1bf   :  { %v330_v51 = vadd.f32 %v329_v50, %v243_v42  ;;  %v389_v54 = vmax.f32 %v327_v47, 0.0 }
 0x1c0   :  { %v392_v53 = vmax.f32 %v338_v49, 0.0 }
 0x1c1   :  { %v390_v55 = vmax.f32 %v330_v51, 0.0 }
 0x1c2   :  { %v406_v56 = vpack.c.bf16 %v392_v53, %v391_v52 }
 0x1c3   :  { %v405_v57 = vpack.c.bf16 %v390_v55, %v389_v54  ;;  %v1460_v58 = vpop.f32.mrb[4].mxu1 }
 0x1c4   :  { %v351_v59 = vadd.f32 %v1460_v58, %v243_v42  ;;  %v342_v60 = vpop.f32.mrb[5].mxu1 }
 0x1c5   :  { %v343_v61 = vadd.f32 %v342_v60, %v243_v42  ;;  %v1461_v62 = vpop.f32.mrb[6].mxu1  ;;  %1486 = vmatprep.mubr.bf16.mxu0 %v405_v57 }
 0x1c6   :  { %v395_v63 = vmax.f32 %v351_v59, 0.0  ;;  %v354_v0 = vadd.f32 %v1461_v62, %v243_v42  ;;  %v345_v1 = vpop.f32.mrb[7].mxu1  ;;  %1487 = vmatmul.mubr.bf16.vlgmr.msra.gmra.mrb[16].mxu0 %v406_v56 }
 0x1c7   :  { %v393_v2 = vmax.f32 %v343_v61, 0.0  ;;  %v346_v3 = vadd.f32 %v345_v1, %v243_v42 }
 0x1c8   :  { %v396_v4 = vmax.f32 %v354_v0, 0.0 }
 0x1c9   :  { %v394_v5 = vmax.f32 %v346_v3, 0.0 }
 0x1ca   :  { %v408_v6 = vpack.c.bf16 %v396_v4, %v395_v63 }
 0x1cb   :  { %v407_v7 = vpack.c.bf16 %v394_v5, %v393_v2  ;;  %v1464_v8 = vpop.f32.mrb[8].mxu1 }
 0x1cc   :  { %v367_v9 = vadd.f32 %v1464_v8, %v243_v42  ;;  %v358_v10 = vpop.f32.mrb[9].mxu1 }
 0x1cd   :  { %1490 = vmatprep.mubr.bf16.mxu0 %v407_v7  ;;  %v359_v11 = vadd.f32 %v358_v10, %v243_v42  ;;  %v1465_v12 = vpop.f32.mrb[10].mxu1 }
 0x1ce   :  { %1491 = vmatmul.mubr.bf16.gmra.mrb[20].mxu0 %v408_v6  ;;  %v399_v13 = vmax.f32 %v367_v9, 0.0  ;;  %v370_v14 = vadd.f32 %v1465_v12, %v243_v42  ;;  %v361_v15 = vpop.f32.mrb[11].mxu1 }
 0x1cf   :  { %v397_v16 = vmax.f32 %v359_v11, 0.0  ;;  %v362_v17 = vadd.f32 %v361_v15, %v243_v42 }
 0x1d0   :  { %v400_v18 = vmax.f32 %v370_v14, 0.0 }
 0x1d1   :  { %v398_v19 = vmax.f32 %v362_v17, 0.0 }
 0x1d2   :  { %v410_v20 = vpack.c.bf16 %v400_v18, %v399_v13 }
 0x1d3   :  { %v409_v21 = vpack.c.bf16 %v398_v19, %v397_v16  ;;  %v1468_v22 = vpop.f32.mrb[12].mxu1 }
 0x1d4   :  { %v383_v23 = vadd.f32 %v1468_v22, %v243_v42  ;;  %v374_v24 = vpop.f32.mrb[13].mxu1 }
 0x1d5   :  { %1494 = vmatprep.mubr.bf16.mxu0 %v409_v21  ;;  %v375_v25 = vadd.f32 %v374_v24, %v243_v42  ;;  %v1469_v26 = vpop.f32.mrb[14].mxu1 }
 0x1d6   :  { %1495 = vmatmul.mubr.bf16.gmra.mrb[24].mxu0 %v410_v20  ;;  %v403_v27 = vmax.f32 %v383_v23, 0.0  ;;  %v386_v28 = vadd.f32 %v1469_v26, %v243_v42  ;;  %v377_v29 = vpop.f32.mrb[15].mxu1 }
 0x1d7   :  { %v401_v30 = vmax.f32 %v375_v25, 0.0  ;;  %v378_v31 = vadd.f32 %v377_v29, %v243_v42 }
 0x1d8   :  { %v404_v32 = vmax.f32 %v386_v28, 0.0 }
 0x1d9   :  { %v402_v33 = vmax.f32 %v378_v31, 0.0 }
 0x1da   :  { %v412_v34 = vpack.c.bf16 %v404_v32, %v403_v27 }
 0x1db   :  { %v411_v35 = vpack.c.bf16 %v402_v33, %v401_v30 }
 0x1dd   :  { %1498 = vmatprep.mubr.bf16.mxu0 %v411_v35 }
 0x1de   :  { %1499 = vmatmul.mubr.bf16.gmra.mrb[28].mxu0 %v412_v34 }
 0x299   :  { %v1488_v39 = vpop.f32.mrb[16].mxu0 }
 0x29a   :  { %v1830_v40 = vadd.f32 %v1488_v39, %v1827_v38  ;;  %v499_v42 = vpop.f32.mrb[17].mxu0 }
 0x29b   :  { %v1833_v44 = vadd.f32 %v499_v42, %v1827_v38  ;;  %v1489_v45 = vpop.f32.mrb[18].mxu0 }
 0x29c   :  { %1526 = vtanh.f32 %v1830_v40  ;;  %v1837_v46 = vadd.f32 %v1489_v45, %v1827_v38  ;;  %v502_v47 = vpop.f32.mrb[19].mxu0 }
 0x29d   :  { %1528 = vtanh.f32 %v1833_v44  ;;  %v1841_v41 = vadd.f32 %v502_v47, %v1827_v38 }
 0x29e   :  { %1530 = vtanh.f32 %v1837_v46 }
 0x29f   :  { %1532 = vtanh.f32 %v1841_v41 }
 0x2a1   :  { %v1492_v43 = vpop.f32.mrb[20].mxu0 }
 0x2a2   :  { %v1846_v48 = vadd.f32 %v1492_v43, %v1827_v38  ;;  %v515_v49 = vpop.f32.mrb[21].mxu0 }
 0x2a3   :  { %v1849_v50 = vadd.f32 %v515_v49, %v1827_v38  ;;  %v1493_v51 = vpop.f32.mrb[22].mxu0 }
 0x2a4   :  { %1534 = vtanh.f32 %v1846_v48  ;;  %v1853_v52 = vadd.f32 %v1493_v51, %v1827_v38  ;;  %v518_v53 = vpop.f32.mrb[23].mxu0 }
 0x2a5   :  { %1536 = vtanh.f32 %v1849_v50  ;;  %v1857_v54 = vadd.f32 %v518_v53, %v1827_v38 }
 0x2a6   :  { %v1527_v55 = vpop.eup %1526  ;;  %1538 = vtanh.f32 %v1853_v52 }
 0x2a7   :  { %v1529_v56 = vpop.eup %1528  ;;  %1540 = vtanh.f32 %v1857_v54  ;;  %v580_v57 = vadd.f32 1.0, %v1527_v55  ;;  %1141 = vst.msk [vmem:[#allocation2 + $0x10] sm:$0xff] %vm882_vm1, %v1527_v55 }
 0x2a8   :  { %v1531_v58 = vpop.eup %1530  ;;  %1139 = vst.msk [vmem:[#allocation2] sm:$0xff] %vm882_vm1, %v1529_v56  ;;  %v578_v3 = vadd.f32 1.0, %v1529_v56 }
 0x2a9   :  { %v1533_v59 = vpop.eup %1532  ;;  %v596_v60 = vmul.f32 6.0, %v580_v57  ;;  %v581_v61 = vadd.f32 1.0, %v1531_v58  ;;  %v1496_v62 = vpop.f32.mrb[24].mxu0  ;;  %1142 = vst.msk [vmem:[#allocation2 + $0x18] sm:$0xff] %vm882_vm1, %v1531_v58 }
 0x2aa   :  { %v1865_v63 = vadd.f32 %v1496_v62, %v1827_v38  ;;  %v531_v0 = vpop.f32.mrb[25].mxu0  ;;  %1140 = vst.msk [vmem:[#allocation2 + $0x8] sm:$0xff] %vm882_vm1, %v1533_v59  ;;  %v579_v9 = vadd.f32 1.0, %v1533_v59  ;;  %v594_v12 = vmul.f32 6.0, %v578_v3 }
 0x2ab   :  { %v1868_v1 = vadd.f32 -10.0, %v596_v60  ;;  %v597_v2 = vmul.f32 6.0, %v581_v61  ;;  %v1871_v4 = vadd.f32 %v531_v0, %v1827_v38  ;;  %v1497_v5 = vpop.f32.mrb[26].mxu0 }
 0x2ac   :  { %1542 = vtanh.f32 %v1865_v63  ;;  %v1875_v6 = vadd.f32 %v1497_v5, %v1827_v38  ;;  %v534_v7 = vpop.f32.mrb[27].mxu0  ;;  %v595_v16 = vmul.f32 6.0, %v579_v9  ;;  %v610_v20 = vadd.f32 -10.0, %v594_v12 }
 0x2ad   :  { %822 = vrot.lane.b32.xlu0 %v1868_v1, %s1679_s2  ;;  %v1879_v8 = vadd.f32 -10.0, %v597_v2  ;;  %1544 = vtanh.f32 %v1871_v4  ;;  %v1886_v13 = vadd.f32 %v534_v7, %v1827_v38  ;;  %v630_v49 = vmul.f32 1.442695, %v1868_v1 }
 0x2ae   :  { %v1535_v10 = vpop.eup %1534  ;;  %1546 = vtanh.f32 %v1875_v6  ;;  %v611_v26 = vadd.f32 -10.0, %v595_v16  ;;  %v626_v42 = vmul.f32 1.442695, %v610_v20 }
 0x2af   :  { %v1537_v11 = vpop.eup %1536  ;;  %824 = vrot.lane.b32.xlu1 %v1879_v8, %s1679_s2  ;;  %1145 = vst.msk [vmem:[#allocation2 + $0x30] sm:$0xff] %vm882_vm1, %v1535_v10  ;;  %1548 = vtanh.f32 %v1886_v13  ;;  %v584_v21 = vadd.f32 1.0, %v1535_v10  ;;  %v632_v56 = vmul.f32 1.442695, %v1879_v8 }
 0x2b0   :  { %v1539_v14 = vpop.eup %1538  ;;  %1143 = vst.msk [vmem:[#allocation2 + $0x20] sm:$0xff] %vm882_vm1, %v1537_v11  ;;  %v582_v35 = vadd.f32 1.0, %v1537_v11  ;;  %v628_v53 = vmul.f32 1.442695, %v611_v26 }
 0x2b1   :  { %v1541_v15 = vpop.eup %1540  ;;  %1240 = vrot.lane.b32.xlu0 %v1868_v1, %s1680_s27  ;;  %v1500_v17 = vpop.f32.mrb[28].mxu0  ;;  %1146 = vst.msk [vmem:[#allocation2 + $0x38] sm:$0xff] %vm882_vm1, %v1539_v14  ;;  %v585_v27 = vadd.f32 1.0, %v1539_v14  ;;  %v600_v30 = vmul.f32 6.0, %v584_v21 }
 0x2b2   :  { %v1894_v18 = vadd.f32 %v1500_v17, %v1827_v38  ;;  %v547_v19 = vpop.f32.mrb[29].mxu0  ;;  %1144 = vst.msk [vmem:[#allocation2 + $0x28] sm:$0xff] %vm882_vm1, %v1541_v15  ;;  %v598_v47 = vmul.f32 6.0, %v582_v35 }
 0x2b3   :  { %1242 = vrot.lane.b32.xlu1 %v1879_v8, %s1680_s27  ;;  %v1901_v22 = vadd.f32 %v547_v19, %v1827_v38  ;;  %v1501_v23 = vpop.f32.mrb[30].mxu0  ;;  %v601_v33 = vmul.f32 6.0, %v585_v27  ;;  %v616_v34 = vadd.f32 -10.0, %v600_v30 }
 0x2b4   :  { %1550 = vtanh.f32 %v1894_v18  ;;  %v1905_v24 = vadd.f32 %v1501_v23, %v1827_v38  ;;  %v550_v25 = vpop.f32.mrb[31].mxu0  ;;  %v614_v55 = vadd.f32 -10.0, %v598_v47 }
 0x2b5   :  { %818 = vrot.lane.b32.xlu0 %v610_v20, %s1679_s2  ;;  %1552 = vtanh.f32 %v1901_v22  ;;  %v1912_v31 = vadd.f32 %v550_v25, %v1827_v38  ;;  %v617_v37 = vadd.f32 -10.0, %v601_v33  ;;  %v583_v38 = vadd.f32 1.0, %v1541_v15 }
 0x2b6   :  { %v1543_v28 = vpop.eup %1542  ;;  %1554 = vtanh.f32 %v1905_v24  ;;  %v638_v10 = vmul.f32 1.442695, %v616_v34  ;;  %v634_v15 = vmul.f32 1.442695, %v614_v55 }
 0x2b7   :  { %v1545_v29 = vpop.eup %1544  ;;  %820 = vrot.lane.b32.xlu1 %v611_v26, %s1679_s2  ;;  %1149 = vst.msk [vmem:[#allocation2 + $0x50] sm:$0xff] %vm882_vm1, %v1543_v28  ;;  %1556 = vtanh.f32 %v1912_v31  ;;  %v599_v51 = vmul.f32 6.0, %v583_v38  ;;  %v588_v59 = vadd.f32 1.0, %v1543_v28  ;;  %v640_v12 = vmul.f32 1.442695, %v617_v37 }
 0x2b8   :  { %v1547_v32 = vpop.eup %1546  ;;  %1147 = vst.msk [vmem:[#allocation2 + $0x40] sm:$0xff] %vm882_vm1, %v1545_v29  ;;  %1558 = vpow2.f32 %v626_v42  ;;  %v586_v7 = vadd.f32 1.0, %v1545_v29 }
 0x2b9   :  { %1236 = vrot.lane.b32.xlu0 %v610_v20, %s1680_s27  ;;  %1150 = vst.msk [vmem:[#allocation2 + $0x58] sm:$0xff] %vm882_vm1, %v1547_v32  ;;  %v1549_v36 = vpop.eup %1548  ;;  %1560 = vpow2.f32 %v630_v49  ;;  %v615_v58 = vadd.f32 -10.0, %v599_v51  ;;  %v589_v61 = vadd.f32 1.0, %v1547_v32  ;;  %v604_v0 = vmul.f32 6.0, %v588_v59 }
 0x2ba   :  { %1148 = vst.msk [vmem:[#allocation2 + $0x48] sm:$0xff] %vm882_vm1, %v1549_v36  ;;  %1562 = vpow2.f32 %v628_v53  ;;  %v587_v9 = vadd.f32 1.0, %v1549_v36  ;;  %v602_v11 = vmul.f32 6.0, %v586_v7  ;;  %v1996_v7 = vld [vmem:[%s2392_s1 + $0x18] sm:$0xff] }
 0x2bb   :  { %1238 = vrot.lane.b32.xlu1 %v611_v26, %s1680_s27  ;;  %1564 = vpow2.f32 %v632_v56  ;;  %v605_v2 = vmul.f32 6.0, %v589_v61  ;;  %v620_v5 = vadd.f32 -10.0, %v604_v0  ;;  %v636_v17 = vmul.f32 1.442695, %v615_v58  ;;  %v1984_v0 = vld [vmem:[%s2392_s1 + $0x10] sm:$0xff] }
 0x2bc   :  { %v603_v14 = vmul.f32 6.0, %v587_v9  ;;  %1566 = vpow2.f32 %v638_v10  ;;  %v618_v16 = vadd.f32 -10.0, %v602_v11 }
 0x2bd   :  { %830 = vrot.lane.b32.xlu0 %v616_v34, %s1679_s2  ;;  %v621_v8 = vadd.f32 -10.0, %v605_v2  ;;  %1568 = vpow2.f32 %v640_v12  ;;  %v646_v33 = vmul.f32 1.442695, %v620_v5  ;;  %v773_v12 = vmul.f32 -0.5, %v1996_v7 }
 0x2be   :  { %v1921_v39 = vpop.eup %1550  ;;  %v619_v19 = vadd.f32 -10.0, %v603_v14  ;;  %1570 = vpow2.f32 %v634_v15 }
 0x2bf   :  { %v1924_v45 = vpop.eup %1552  ;;  %832 = vrot.lane.b32.xlu1 %v617_v37, %s1679_s2  ;;  %1153 = vst.msk [vmem:[#allocation2 + $0x70] sm:$0xff] %vm882_vm1, %v1921_v39  ;;  %1572 = vpow2.f32 %v636_v17  ;;  %v592_v20 = vadd.f32 1.0, %v1921_v39  ;;  %v648_v36 = vmul.f32 1.442695, %v621_v8  ;;  %v642_v39 = vmul.f32 1.442695, %v618_v16 }
 0x2c0   :  { %v1555_v43 = vpop.eup %1554  ;;  %1151 = vst.msk [vmem:[#allocation2 + $0x60] sm:$0xff] %vm882_vm1, %v1924_v45  ;;  %v590_v27 = vadd.f32 1.0, %v1924_v45  ;;  %1574 = vpow2.f32 %v646_v33  ;;  %v644_v45 = vmul.f32 1.442695, %v619_v19 }
 0x2c1   :  { %1248 = vrot.lane.b32.xlu0 %v616_v34, %s1680_s27  ;;  %1154 = vst.msk [vmem:[#allocation2 + $0x78] sm:$0xff] %vm882_vm1, %v1555_v43  ;;  %v1557_v57 = vpop.eup %1556  ;;  %v593_v23 = vadd.f32 1.0, %v1555_v43  ;;  %v608_v26 = vmul.f32 6.0, %v592_v20  ;;  %1576 = vpow2.f32 %v648_v36  ;;  %v2015_v20 = vld [vmem:[%s2392_s1 + $0x30] sm:$0xff] }
 0x2c2   :  { %1152 = vst.msk [vmem:[#allocation2 + $0x68] sm:$0xff] %vm882_vm1, %v1557_v57  ;;  %v1559_v60 = vpop.eup %1558  ;;  %v591_v30 = vadd.f32 1.0, %v1557_v57  ;;  %v606_v35 = vmul.f32 6.0, %v590_v27  ;;  %1578 = vpow2.f32 %v642_v39 }
 0x2c3   :  { %1250 = vrot.lane.b32.xlu1 %v617_v37, %s1680_s27  ;;  %v1561_v62 = vpop.eup %1560  ;;  %v609_v29 = vmul.f32 6.0, %v593_v23  ;;  %v1959_v34 = vadd.f32 -10.0, %v608_v26  ;;  %1580 = vpow2.f32 %v644_v45  ;;  %v2022_v26 = vld [vmem:[%s2392_s1 + $0x38] sm:$0xff]  ;;  %v2036_v45 = vld [vmem:[%s2392_s1 + $0x20] sm:$0xff] }
 0x2c4   :  { %v1563_v1 = vpop.eup %1562  ;;  %v607_v38 = vmul.f32 6.0, %v591_v30  ;;  %v622_v42 = vadd.f32 -10.0, %v606_v35  ;;  %v777_v35 = vmul.f32 -0.5, %v2022_v26 }
 0x2c5   :  { %826 = vrot.lane.b32.xlu0 %v614_v55, %s1679_s2  ;;  %v1565_v3 = vpop.eup %1564  ;;  %2397 = vst [vmem:[#allocation5_spill] sm:$0xff] %v1959_v34  ;;  %v1963_v37 = vadd.f32 -10.0, %v609_v29  ;;  %v654_v43 = vmul.f32 1.442695, %v1959_v34 }
 0x2c6   :  { %v1567_v21 = vpop.eup %1566  ;;  %v623_v47 = vadd.f32 -10.0, %v607_v38  ;;  %v650_v51 = vmul.f32 1.442695, %v622_v42 }
 0x2c7   :  { %828 = vrot.lane.b32.xlu1 %v615_v58, %s1679_s2  ;;  %v1569_v25 = vpop.eup %1568  ;;  %2398 = vst [vmem:[#allocation6_spill] sm:$0xff] %v1963_v37  ;;  %v656_v49 = vmul.f32 1.442695, %v1963_v37  ;;  %1582 = vpow2.f32 %v654_v43  ;;  %v793_v43 = vmul.f32 %v777_v35, %v2022_v26  ;;  %v2083_v35 = vld [vmem:[%s2392_s1 + $0x40] sm:$0xff] }
 0x2c8   :  { %v1571_v28 = vpop.eup %1570 }
 0x2c9   :  { %1244 = vrot.lane.b32.xlu0 %v614_v55, %s1680_s27  ;;  %v1573_v32 = vpop.eup %1572  ;;  %1584 = vpow2.f32 %v656_v49  ;;  %v652_v55 = vmul.f32 1.442695, %v623_v47 }
 0x2ca   :  { %v1575_v53 = vpop.eup %1574  ;;  %1586 = vpow2.f32 %v650_v51  ;;  %v2043_v51 = vld [vmem:[%s2392_s1 + $0x28] sm:$0xff] }
 0x2cb   :  { %1246 = vrot.lane.b32.xlu1 %v615_v58, %s1680_s27  ;;  %v1577_v56 = vpop.eup %1576  ;;  %1588 = vpow2.f32 %v652_v55  ;;  %v774_v55 = vmul.f32 -0.5, %v2036_v45 }
 0x2cc   :  { %v1579_v57 = vpop.eup %1578 }
 0x2cd   :  { %690 = vrot.lane.b32.xlu0 %v1559_v60, %s1679_s2  ;;  %v1581_v58 = vpop.eup %1580 }
 0x2cf   :  { %694 = vrot.lane.b32.xlu1 %v1561_v62, %s1679_s2 }
 0x2d1   :  { %692 = vrot.lane.b32.xlu0 %v1563_v1, %s1679_s2  ;;  %v1583_v59 = vpop.eup %1582  ;;  %v772_v1 = vmul.f32 -0.5, %v1984_v0 }
 0x2d3   :  { %696 = vrot.lane.b32.xlu1 %v1565_v3, %s1679_s2  ;;  %v1585_v60 = vpop.eup %1584  ;;  %v788_v2 = vmul.f32 %v772_v1, %v1984_v0  ;;  %v1991_v3 = vld [vmem:[%s2392_s1] sm:$0xff] }
 0x2d4   :  { %v1587_v61 = vpop.eup %1586  ;;  %v770_v10 = vmul.f32 -0.5, %v1991_v3 }
 0x2d5   :  { %838 = vrot.lane.b32.xlu0 %v620_v5, %s1679_s2  ;;  %v1589_v62 = vpop.eup %1588 }
 0x2d6   :  { %v786_v17 = vmul.f32 %v770_v10, %v1991_v3 }
 0x2d7   :  { %840 = vrot.lane.b32.xlu1 %v621_v8, %s1679_s2 }
 0x2d9   :  { %1256 = vrot.lane.b32.xlu0 %v620_v5, %s1680_s27 }
 0x2db   :  { %1258 = vrot.lane.b32.xlu1 %v621_v8, %s1680_s27  ;;  %v2001_v8 = vld [vmem:[%s2392_s1 + $0x8] sm:$0xff] }
 0x2dc   :  { %v771_v15 = vmul.f32 -0.5, %v2001_v8 }
 0x2dd   :  { %834 = vrot.lane.b32.xlu0 %v618_v16, %s1679_s2 }
 0x2de   :  { %v787_v23 = vmul.f32 %v771_v15, %v2001_v8 }
 0x2df   :  { %836 = vrot.lane.b32.xlu1 %v619_v19, %s1679_s2 }
 0x2e1   :  { %1252 = vrot.lane.b32.xlu0 %v618_v16, %s1680_s27 }
 0x2e3   :  { %1254 = vrot.lane.b32.xlu1 %v619_v19, %s1680_s27 }
 0x2e5   :  { %702 = vrot.lane.b32.xlu0 %v1567_v21, %s1679_s2  ;;  %v789_v21 = vmul.f32 %v773_v12, %v1996_v7 }
 0x2e7   :  { %704 = vrot.lane.b32.xlu1 %v1569_v25, %s1679_s2 }
 0x2e9   :  { %698 = vrot.lane.b32.xlu0 %v1571_v28, %s1679_s2  ;;  %v776_v28 = vmul.f32 -0.5, %v2015_v20 }
 0x2eb   :  { %700 = vrot.lane.b32.xlu1 %v1573_v32, %s1679_s2  ;;  %v792_v39 = vmul.f32 %v776_v28, %v2015_v20 }
 0x2ed   :  { %846 = vrot.lane.b32.xlu0 %v1959_v34, %s1679_s2 }
 0x2ef   :  { %848 = vrot.lane.b32.xlu1 %v1963_v37, %s1679_s2 }
 0x2f1   :  { %842 = vrot.lane.b32.xlu0 %v622_v42, %s1679_s2 }
 0x2f3   :  { %844 = vrot.lane.b32.xlu1 %v623_v47, %s1679_s2 }
 0x2f5   :  { %1260 = vrot.lane.b32.xlu0 %v622_v42, %s1680_s27 }
 0x2f7   :  { %1262 = vrot.lane.b32.xlu1 %v623_v47, %s1680_s27 }
 0x2f9   :  { %710 = vrot.lane.b32.xlu0 %v1575_v53, %s1679_s2 }
 0x2fb   :  { %712 = vrot.lane.b32.xlu1 %v1577_v56, %s1679_s2 }
 0x2fd   :  { %706 = vrot.lane.b32.xlu0 %v1579_v57, %s1679_s2 }
 0x2ff   :  { %708 = vrot.lane.b32.xlu1 %v1581_v58, %s1679_s2 }
 0x301   :  { %718 = vrot.lane.b32.xlu0 %v1583_v59, %s1679_s2  ;;  %v775_v59 = vmul.f32 -0.5, %v2043_v51 }
 0x303   :  { %720 = vrot.lane.b32.xlu1 %v1585_v60, %s1679_s2 }
 0x305   :  { %714 = vrot.lane.b32.xlu0 %v1587_v61, %s1679_s2 }
 0x307   :  { %716 = vrot.lane.b32.xlu1 %v1589_v62, %s1679_s2  ;;  %v790_v62 = vmul.f32 %v774_v55, %v2036_v45 }
 0x31f   :  { %v823_v5 = vpop.permute.xlu0 %822 }
 0x320   :  { %v868_v9 = vsub.f32 %v788_v2, %v823_v5  ;;  %v791_v2 = vmul.f32 %v775_v59, %v2043_v51 }
 0x321   :  { %v825_v11 = vpop.permute.xlu1 %824 }
 0x322   :  { %v889_v14 = vsel %vm882_vm1, %v868_v9, 0.0  ;;  %v869_v30 = vsub.f32 %v789_v21, %v825_v11  ;;  %v2064_v21 = vld [vmem:[%s2392_s1 + $0x50] sm:$0xff] }
 0x323   :  { %v2007_v16 = vpop.permute.xlu0 %1240 }
 0x324   :  { %890 = vadd.xlane.f32.xlu0 %v889_v14  ;;  %v892_v47 = vsel %vm882_vm1, %v869_v30, 0.0 }
 0x325   :  { %v2010_v19 = vpop.permute.xlu1 %1242 }
 0x327   :  { %v819_v25 = vpop.permute.xlu0 %818 }
 0x328   :  { %v866_v27 = vsub.f32 %v786_v17, %v819_v25  ;;  %v2071_v25 = vld [vmem:[%s2392_s1 + $0x58] sm:$0xff] }
 0x329   :  { %v821_v29 = vpop.permute.xlu1 %820 }
 0x32a   :  { %v867_v32 = vsub.f32 %v787_v23, %v821_v29  ;;  %v883_v33 = vsel %vm882_vm1, %v866_v27, 0.0  ;;  %v780_v27 = vmul.f32 -0.5, %v2064_v21  ;;  %v781_v29 = vmul.f32 -0.5, %v2071_v25 }
 0x32b   :  { %v2027_v36 = vpop.permute.xlu0 %1236  ;;  %884 = vadd.xlane.f32.xlu0 %v883_v33 }
 0x32c   :  { %v886_v38 = vsel %vm882_vm1, %v867_v32, 0.0  ;;  %v796_v32 = vmul.f32 %v780_v27, %v2064_v21 }
 0x32d   :  { %887 = vadd.xlane.f32.xlu1 %v886_v38  ;;  %v2031_v42 = vpop.permute.xlu1 %1238  ;;  %v797_v38 = vmul.f32 %v781_v29, %v2071_v25 }
 0x32f   :  { %v831_v49 = vpop.permute.xlu0 %830  ;;  %893 = vadd.xlane.f32.xlu0 %v892_v47  ;;  %v2089_v47 = vld [vmem:[%s2392_s1 + $0x48] sm:$0xff] }
 0x330   :  { %v872_v53 = vsub.f32 %v792_v39, %v831_v49  ;;  %v778_v49 = vmul.f32 -0.5, %v2083_v35 }
 0x331   :  { %v833_v56 = vpop.permute.xlu1 %832 }
 0x332   :  { %v873_v57 = vsub.f32 %v793_v43, %v833_v56  ;;  %v901_v58 = vsel %vm882_vm1, %v872_v53, 0.0 }
 0x333   :  { %902 = vadd.xlane.f32.xlu1 %v901_v58  ;;  %v2048_v60 = vpop.permute.xlu0 %1248 }
 0x334   :  { %v904_v61 = vsel %vm882_vm1, %v873_v57, 0.0  ;;  %v779_v57 = vmul.f32 -0.5, %v2089_v47 }
 0x335   :  { %v2052_v1 = vpop.permute.xlu1 %1250  ;;  %905 = vadd.xlane.f32.xlu0 %v904_v61  ;;  %v794_v61 = vmul.f32 %v778_v49, %v2083_v35 }
 0x337   :  { %v827_v5 = vpop.permute.xlu0 %826 }
 0x338   :  { %v870_v9 = vsub.f32 %v790_v62, %v827_v5 }
 0x339   :  { %v829_v10 = vpop.permute.xlu1 %828 }
 0x33a   :  { %v871_v11 = vsub.f32 %v791_v2, %v829_v10  ;;  %v895_v12 = vsel %vm882_vm1, %v870_v9, 0.0  ;;  %v795_v2 = vmul.f32 %v779_v57, %v2089_v47  ;;  %v2127_v57 = vld [vmem:[%s2392_s1 + $0x68] sm:$0xff] }
 0x33b   :  { %896 = vadd.xlane.f32.xlu1 %v895_v12  ;;  %v2056_v14 = vpop.permute.xlu0 %1244 }
 0x33c   :  { %v898_v15 = vsel %vm882_vm1, %v871_v11, 0.0 }
 0x33d   :  { %v2059_v17 = vpop.permute.xlu1 %1246  ;;  %899 = vadd.xlane.f32.xlu0 %v898_v15 }
 0x33e   :  { %2399 = vst [vmem:[#allocation7_spill] sm:$0xff] %v2059_v17 }
 0x33f   :  { %v2066_v23 = vpop.permute.xlu0 %690 }
 0x341   :  { %v695_v28 = vpop.permute.xlu1 %694 }
 0x342   :  { %v740_v17 = vmul.f32 %v695_v28, %v1984_v0 }
 0x343   :  { %v2075_v30 = vpop.permute.xlu0 %692 }
 0x345   :  { %v2078_v33 = vpop.permute.xlu1 %696 }
 0x346   :  { %v741_v0 = vmul.f32 %v2078_v33, %v1996_v7 }
 0x347   :  { %v839_v39 = vpop.permute.xlu0 %838 }
 0x348   :  { %v876_v43 = vsub.f32 %v796_v32, %v839_v39  ;;  %v2110_v32 = vld [vmem:[%s2392_s1 + $0x70] sm:$0xff]  ;;  %v2115_v39 = vld [vmem:[%s2392_s1 + $0x78] sm:$0xff] }
 0x349   :  { %v841_v53 = vpop.permute.xlu1 %840 }
 0x34a   :  { %v877_v55 = vsub.f32 %v797_v38, %v841_v53  ;;  %v913_v56 = vsel %vm882_vm1, %v876_v43, 0.0  ;;  %v784_v43 = vmul.f32 -0.5, %v2110_v32  ;;  %v2121_v53 = vld [vmem:[%s2392_s1 + $0x60] sm:$0xff]  ;;  %s1681_s1 = smov [#allocation2]  }
 0x34b   :  { %914 = vadd.xlane.f32.xlu1 %v913_v56  ;;  %v2094_v58 = vpop.permute.xlu0 %1256 }
 0x34c   :  { %2400 = vst [vmem:[#allocation8_spill] sm:$0xff] %v2094_v58  ;;  %v916_v59 = vsel %vm882_vm1, %v877_v55, 0.0  ;;  %v785_v55 = vmul.f32 -0.5, %v2115_v39 }
 0x34d   :  { %v2098_v62 = vpop.permute.xlu1 %1258  ;;  %917 = vadd.xlane.f32.xlu0 %v916_v59  ;;  %v800_v59 = vmul.f32 %v784_v43, %v2110_v32 }
 0x34e   :  { %2401 = vst [vmem:[#allocation9_spill] sm:$0xff] %v2098_v62 }
 0x34f   :  { %v835_v5 = vpop.permute.xlu0 %834 }
 0x350   :  { %v874_v9 = vsub.f32 %v794_v61, %v835_v5  ;;  %v782_v61 = vmul.f32 -0.5, %v2121_v53  ;;  %v801_v5 = vmul.f32 %v785_v55, %v2115_v39 }
 0x351   :  { %v837_v10 = vpop.permute.xlu1 %836 }
 0x352   :  { %v875_v11 = vsub.f32 %v795_v2, %v837_v10  ;;  %v907_v12 = vsel %vm882_vm1, %v874_v9, 0.0  ;;  %v783_v9 = vmul.f32 -0.5, %v2127_v57 }
 0x353   :  { %908 = vadd.xlane.f32.xlu1 %v907_v12  ;;  %v2102_v15 = vpop.permute.xlu0 %1252  ;;  %v798_v12 = vmul.f32 %v782_v61, %v2121_v53 }
 0x354   :  { %2402 = vst [vmem:[#allocation10_spill] sm:$0xff] %v2102_v15  ;;  %v910_v27 = vsel %vm882_vm1, %v875_v11, 0.0 }
 0x355   :  { %v2105_v29 = vpop.permute.xlu1 %1254  ;;  %911 = vadd.xlane.f32.xlu0 %v910_v27 }
 0x356   :  { %2403 = vst [vmem:[#allocation11_spill] sm:$0xff] %v2105_v29  ;;  %v799_v29 = vmul.f32 %v783_v9, %v2127_v57  ;;  %v756_v9 = vadd.f32 %v740_v17, %v1830_v40  ;;  %v757_v40 = vadd.f32 %v741_v0, %v1837_v46 }
 0x357   :  { %v703_v38 = vpop.permute.xlu0 %702 }
 0x358   :  { %1590 = vtanh.f32 %v756_v9 }
 0x359   :  { %v705_v49 = vpop.permute.xlu1 %704 }
 0x35a   :  { %v745_v17 = vmul.f32 %v705_v49, %v2022_v26 }
 0x35b   :  { %v699_v56 = vpop.permute.xlu0 %698 }
 0x35d   :  { %v701_v2 = vpop.permute.xlu1 %700 }
 0x35e   :  { %v743_v33 = vmul.f32 %v701_v2, %v2043_v51 }
 0x35f   :  { %v847_v10 = vpop.permute.xlu0 %846 }
 0x360   :  { %v880_v11 = vsub.f32 %v800_v59, %v847_v10  ;;  %v759_v26 = vadd.f32 %v743_v33, %v1857_v54 }
 0x361   :  { %v849_v27 = vpop.permute.xlu1 %848 }
 0x362   :  { %v881_v34 = vsub.f32 %v801_v5, %v849_v27  ;;  %v925_v37 = vsel %vm882_vm1, %v880_v11, 0.0  ;;  %v738_v5 = vmul.f32 %v2066_v23, %v1991_v3  ;;  %v744_v3 = vmul.f32 %v703_v38, %v2015_v20 }
 0x363   :  { %926 = vadd.xlane.f32.xlu1 %v925_v37  ;;  %v843_v62 = vpop.permute.xlu0 %842  ;;  %v739_v37 = vmul.f32 %v2075_v30, %v2001_v8  ;;  %v742_v23 = vmul.f32 %v699_v56, %v2036_v45  ;;  %v761_v30 = vadd.f32 %v745_v17, %v1853_v52 }
 0x364   :  { %v878_v43 = vsub.f32 %v798_v12, %v843_v62  ;;  %v928_v15 = vsel %vm882_vm1, %v881_v34, 0.0  ;;  %v754_v34 = vadd.f32 %v738_v5, %v1833_v44  ;;  %v760_v44 = vadd.f32 %v744_v3, %v1846_v48 }
 0x365   :  { %v845_v55 = vpop.permute.xlu1 %844  ;;  %929 = vadd.xlane.f32.xlu0 %v928_v15  ;;  %v758_v20 = vadd.f32 %v742_v23, %v1849_v50 }
 0x366   :  { %v879_v58 = vsub.f32 %v799_v29, %v845_v55  ;;  %v919_v59 = vsel %vm882_vm1, %v878_v43, 0.0  ;;  %1592 = vtanh.f32 %v754_v34 }
 0x367   :  { %920 = vadd.xlane.f32.xlu1 %v919_v59  ;;  %v2148_v28 = vpop.permute.xlu0 %1260 }
 0x368   :  { %v922_v61 = vsel %vm882_vm1, %v879_v58, 0.0  ;;  %v755_v58 = vadd.f32 %v739_v37, %v1841_v41  ;;  %v1591_v41 = vpop.eup %1590 }
 0x369   :  { %923 = vadd.xlane.f32.xlu0 %v922_v61  ;;  %v2150_v62 = vpop.permute.xlu1 %1262  ;;  %v965_v12 = vmul.f32 %v1591_v41, %v1591_v41 }
 0x36a   :  { %1594 = vtanh.f32 %v755_v58 }
 0x36b   :  { %v711_v8 = vpop.permute.xlu0 %710  ;;  %1596 = vtanh.f32 %v757_v40  ;;  %v981_v43 = vsub.f32 1.0, %v965_v12 }
 0x36c   :  { %1598 = vtanh.f32 %v760_v44  ;;  %v748_v46 = vmul.f32 %v711_v8, %v2064_v21 }
 0x36d   :  { %v713_v7 = vpop.permute.xlu1 %712  ;;  %1600 = vtanh.f32 %v761_v30  ;;  %v997_v61 = vmax.f32 %v981_v43, 0.0 }
 0x36e   :  { %v749_v48 = vmul.f32 %v713_v7, %v2071_v25  ;;  %1602 = vtanh.f32 %v758_v20  ;;  %v764_v52 = vadd.f32 %v748_v46, %v1865_v63 }
 0x36f   :  { %v707_v45 = vpop.permute.xlu0 %706  ;;  %1604 = vtanh.f32 %v759_v26  ;;  %v1013_v9 = vadd.f32 1e-06, %v997_v61 }
 0x370   :  { %v1593_v29 = vpop.eup %1592  ;;  %v746_v51 = vmul.f32 %v707_v45, %v2083_v35  ;;  %v765_v50 = vadd.f32 %v749_v48, %v1875_v6  ;;  %1606 = vtanh.f32 %v764_v52 }
 0x371   :  { %v709_v15 = vpop.permute.xlu1 %708  ;;  %v963_v55 = vmul.f32 %v1593_v29, %v1593_v29 }
 0x372   :  { %v747_v21 = vmul.f32 %v709_v15, %v2089_v47  ;;  %v762_v25 = vadd.f32 %v746_v51, %v1871_v4  ;;  %1608 = vtanh.f32 %v765_v50 }
 0x373   :  { %v979_v5 = vsub.f32 1.0, %v963_v55  ;;  %v719_v17 = vpop.permute.xlu0 %718 }
 0x374   :  { %v2170_v38 = vpop.eup %1594  ;;  %v763_v63 = vadd.f32 %v747_v21, %v1886_v13  ;;  %1610 = vtanh.f32 %v762_v25  ;;  %v752_v23 = vmul.f32 %v719_v17, %v2110_v32 }
 0x375   :  { %v1597_v54 = vpop.eup %1596  ;;  %v995_v37 = vmax.f32 %v979_v5, 0.0  ;;  %v721_v7 = vpop.permute.xlu1 %720  ;;  %v964_v15 = vmul.f32 %v2170_v38, %v2170_v38 }
 0x376   :  { %v2177_v35 = vpop.eup %1598  ;;  %1612 = vtanh.f32 %v763_v63  ;;  %v966_v56 = vmul.f32 %v1597_v54, %v1597_v54  ;;  %v753_v20 = vmul.f32 %v721_v7, %v2115_v39 }
 0x377   :  { %v2179_v49 = vpop.eup %1600  ;;  %v1011_v34 = vadd.f32 1e-06, %v995_v37  ;;  %v969_v50 = vmul.f32 %v2177_v35, %v2177_v35 }
 0x378   :  { %1175 = vrot.lane.b32.xlu1 %v1591_v41, %s1680_s27  ;;  %v2185_v6 = vpop.eup %1602  ;;  %v982_v11 = vsub.f32 1.0, %v966_v56  ;;  %v768_v41 = vadd.f32 %v752_v23, %v1894_v18  ;;  %v769_v48 = vadd.f32 %v753_v20, %v1905_v24  ;;  %v980_v18 = vsub.f32 1.0, %v964_v15  ;;  %v715_v24 = vpop.permute.xlu0 %714 }
 0x379   :  { %v2187_v4 = vpop.eup %1604  ;;  %v717_v46 = vpop.permute.xlu1 %716 }
 0x37a   :  { %v2193_v13 = vpop.eup %1606  ;;  %v998_v27 = vmax.f32 %v982_v11, 0.0  ;;  %v751_v45 = vmul.f32 %v717_v46, %v2127_v57  ;;  %v996_v52 = vmax.f32 %v980_v18, 0.0  ;;  %v750_v57 = vmul.f32 %v715_v24, %v2121_v53 }
 0x37b   :  { %v973_v11 = vmul.f32 %v2193_v13, %v2193_v13 }
 0x37c   :  { %1171 = vrot.lane.b32.xlu1 %v1593_v29, %s1680_s27  ;;  %v2195_v47 = vpop.eup %1608  ;;  %v1014_v59 = vadd.f32 1e-06, %v998_v27  ;;  %v767_v32 = vadd.f32 %v751_v45, %v1912_v31  ;;  %v1012_v31 = vadd.f32 1e-06, %v996_v52  ;;  %v766_v21 = vadd.f32 %v750_v57, %v1901_v22 }
 0x37d   :  { %v989_v43 = vsub.f32 1.0, %v973_v11 }
 0x37e   :  { %v2201_v2 = vpop.eup %1610  ;;  %1614 = vlog2.f32 %v1014_v59 }
 0x37f   :  { %1173 = vrot.lane.b32.xlu0 %v2170_v38, %s1680_s27  ;;  %1616 = vlog2.f32 %v1013_v9  ;;  %v967_v38 = vmul.f32 %v2185_v6, %v2185_v6  ;;  %v971_v22 = vmul.f32 %v2201_v2, %v2201_v2  ;;  %v1005_v5 = vmax.f32 %v989_v43, 0.0 }
 0x380   :  { %1177 = vrot.lane.b32.xlu1 %v1597_v54, %s1680_s27  ;;  %v2203_v10 = vpop.eup %1612  ;;  %1618 = vlog2.f32 %v1011_v34  ;;  %v985_v54 = vsub.f32 1.0, %v969_v50  ;;  %v968_v43 = vmul.f32 %v2187_v4, %v2187_v4 }
 0x381   :  { %1620 = vtanh.f32 %v768_v41  ;;  %v983_v63 = vsub.f32 1.0, %v967_v38  ;;  %v987_v9 = vsub.f32 1.0, %v971_v22 }
 0x382   :  { %1622 = vtanh.f32 %v769_v48  ;;  %v1001_v56 = vmax.f32 %v985_v54, 0.0 }
 0x383   :  { %1183 = vrot.lane.b32.xlu0 %v2177_v35, %s1680_s27  ;;  %1624 = vtanh.f32 %v767_v32  ;;  %v999_v53 = vmax.f32 %v983_v63, 0.0 }
 0x384   :  { %1185 = vrot.lane.b32.xlu1 %v2179_v49, %s1680_s27  ;;  %1626 = vlog2.f32 %v1012_v31  ;;  %v1017_v35 = vadd.f32 1e-06, %v1001_v56  ;;  %v970_v56 = vmul.f32 %v2179_v49, %v2179_v49 }
 0x385   :  { %1628 = vtanh.f32 %v766_v21  ;;  %v1015_v61 = vadd.f32 1e-06, %v999_v53 }
 0x386   :  { %1630 = vlog2.f32 %v1017_v35 }
 0x387   :  { %1179 = vrot.lane.b32.xlu0 %v2185_v6, %s1680_s27  ;;  %1632 = vlog2.f32 %v1015_v61 }
 0x388   :  { %1181 = vrot.lane.b32.xlu1 %v2187_v4, %s1680_s27  ;;  %v1615_v0 = vpop.eup %1614 }
 0x389   :  { %v1034_v58 = vmul.f32 0.6931472, %v1615_v0  ;;  %v1617_v3 = vpop.eup %1616 }
 0x38a   :  { %v1032_v8 = vmul.f32 0.6931472, %v1617_v3  ;;  %v1619_v44 = vpop.eup %1618  ;;  %v1003_v3 = vmax.f32 %v987_v9, 0.0 }
 0x38b   :  { %1191 = vrot.lane.b32.xlu0 %v2193_v13, %s1680_s27  ;;  %v1068_v40 = vsel %vm882_vm1, %v1034_v58, 0.0  ;;  %v1028_v33 = vmul.f32 0.6931472, %v1619_v44  ;;  %v1621_v29 = vpop.eup %1620 }
 0x38c   :  { %1193 = vrot.lane.b32.xlu1 %v2195_v47, %s1680_s27  ;;  %v1065_v30 = vsel %vm882_vm1, %v1032_v8, 0.0  ;;  %v2221_v39 = vpop.eup %1622  ;;  %v977_v37 = vmul.f32 %v1621_v29, %v1621_v29  ;;  %v1019_v23 = vadd.f32 1e-06, %v1003_v3 }
 0x38d   :  { %v1059_v26 = vsel %vm882_vm1, %v1028_v33, 0.0  ;;  %v2225_v51 = vpop.eup %1624 }
 0x38e   :  { %v1627_v27 = vpop.eup %1626 }
 0x38f   :  { %1187 = vrot.lane.b32.xlu0 %v2201_v2, %s1680_s27  ;;  %v1030_v59 = vmul.f32 0.6931472, %v1627_v27  ;;  %v1629_v13 = vpop.eup %1628  ;;  %v1021_v2 = vadd.f32 1e-06, %v1005_v5 }
 0x390   :  { %1189 = vrot.lane.b32.xlu1 %v2203_v10, %s1680_s27  ;;  %v975_v17 = vmul.f32 %v1629_v13, %v1629_v13  ;;  %v1631_v41 = vpop.eup %1630 }
 0x391   :  { %v1062_v58 = vsel %vm882_vm1, %v1030_v59, 0.0  ;;  %1634 = vlog2.f32 %v1021_v2  ;;  %v1633_v48 = vpop.eup %1632  ;;  %v1040_v32 = vmul.f32 0.6931472, %v1631_v41  ;;  %v986_v59 = vsub.f32 1.0, %v970_v56 }
 0x392   :  { %1636 = vlog2.f32 %v1019_v23  ;;  %v1036_v24 = vmul.f32 0.6931472, %v1633_v48 }
 0x393   :  { %v1077_v52 = vsel %vm882_vm1, %v1040_v32, 0.0  ;;  %v1002_v4 = vmax.f32 %v986_v59, 0.0 }
 0x394   :  { %v1071_v21 = vsel %vm882_vm1, %v1036_v24, 0.0 }
 0x39b   :  { %v1635_v31 = vpop.eup %1634 }
 0x39c   :  { %v1048_v38 = vmul.f32 0.6931472, %v1635_v31  ;;  %v1637_v54 = vpop.eup %1636  ;;  %v2407_v31 = vld [vmem:[#allocation9_spill] sm:$0xff] }
 0x39d   :  { %v1044_v27 = vmul.f32 0.6931472, %v1637_v54 }
 0x39e   :  { %v1089_v53 = vsel %vm882_vm1, %v1048_v38, 0.0 }
 0x39f   :  { %v1083_v61 = vsel %vm882_vm1, %v1044_v27, 0.0 }
 0x3ae   :  { %1069 = vadd.xlane.f32.xlu0 %v1068_v40  ;;  %v993_v40 = vsub.f32 1.0, %v977_v37  ;;  %v984_v37 = vsub.f32 1.0, %v968_v43 }
 0x3b0   :  { %v1009_v7 = vmax.f32 %v993_v40, 0.0  ;;  %v1000_v3 = vmax.f32 %v984_v37, 0.0  ;;  %v1018_v40 = vadd.f32 1e-06, %v1002_v4 }
 0x3b1   :  { %v2235_v25 = vpop.xlane.xlu0 %890 }
 0x3b2   :  { %v1025_v46 = vadd.f32 1e-06, %v1009_v7  ;;  %v1016_v7 = vadd.f32 1e-06, %v1000_v3 }
 0x3b4   :  { %1066 = vadd.xlane.f32.xlu1 %v1065_v30  ;;  %v991_v30 = vsub.f32 1.0, %v975_v17  ;;  %1638 = vlog2.f32 %v1025_v46 }
 0x3b8   :  { %1060 = vadd.xlane.f32.xlu1 %v1059_v26  ;;  %v2239_v12 = vpop.xlane.xlu0 %884  ;;  %v1007_v26 = vmax.f32 %v991_v30, 0.0 }
 0x3ba   :  { %v2243_v55 = vpop.xlane.xlu1 %887 }
 0x3bc   :  { %v2245_v6 = vpop.xlane.xlu0 %893 }
 0x3be   :  { %v1639_v35 = vpop.eup %1638 }
 0x3bf   :  { %v1056_v5 = vmul.f32 0.6931472, %v1639_v35 }
 0x3c0   :  { %v2247_v34 = vpop.xlane.xlu1 %902 }
 0x3c2   :  { %v2249_v0 = vpop.xlane.xlu0 %905 }
 0x3c4   :  { %1199 = vrot.lane.b32.xlu0 %v1621_v29, %s1680_s27  ;;  %v1023_v29 = vadd.f32 1e-06, %v1007_v26  ;;  %v2405_v26 = vld [vmem:[#allocation7_spill] sm:$0xff] }
 0x3c6   :  { %1640 = vlog2.f32 %v1023_v29 }
 0x3c7   :  { %1642 = vlog2.f32 %v1018_v40 }
 0x3c8   :  { %v2252_v8 = vpop.xlane.xlu1 %896  ;;  %1644 = vlog2.f32 %v1016_v7 }
 0x3c9   :  { %1201 = vrot.lane.b32.xlu1 %v2221_v39, %s1680_s27 }
 0x3ca   :  { %v2254_v44 = vpop.xlane.xlu0 %899 }
 0x3cd   :  { %1197 = vrot.lane.b32.xlu1 %v2225_v51, %s1680_s27 }
 0x3d0   :  { %v1641_v9 = vpop.eup %1640 }
 0x3d1   :  { %v1052_v2 = vmul.f32 0.6931472, %v1641_v9  ;;  %v1643_v56 = vpop.eup %1642 }
 0x3d2   :  { %v1645_v35 = vpop.eup %1644  ;;  %v1042_v43 = vmul.f32 0.6931472, %v1643_v56 }
 0x3d3   :  { %v1095_v23 = vsel %vm882_vm1, %v1052_v2, 0.0 }
 0x3d8   :  { %v2256_v33 = vpop.xlane.xlu1 %914 }
 0x3da   :  { %v2258_v20 = vpop.xlane.xlu0 %917 }
 0x3e0   :  { %v2260_v45 = vpop.xlane.xlu1 %908 }
 0x3e2   :  { %v2262_v15 = vpop.xlane.xlu0 %911 }
 0x3e3   :  { %1063 = vadd.xlane.f32.xlu0 %v1062_v58  ;;  %v1101_v58 = vsel %vm882_vm1, %v1056_v5, 0.0 }
 0x3f0   :  { %v2264_v18 = vpop.xlane.xlu1 %926 }
 0x3f1   :  { %1078 = vadd.xlane.f32.xlu1 %v1077_v52  ;;  %v976_v52 = vmul.f32 %v2225_v51, %v2225_v51  ;;  %v2408_v51 = vld [vmem:[#allocation11_spill] sm:$0xff] }
 0x3f2   :  { %v2267_v57 = vpop.xlane.xlu0 %929 }
 0x3f3   :  { %v992_v54 = vsub.f32 1.0, %v976_v52 }
 0x3f4   :  { %v2269_v50 = vpop.xlane.xlu1 %920 }
 0x3f5   :  { %1072 = vadd.xlane.f32.xlu1 %v1071_v21  ;;  %v1008_v27 = vmax.f32 %v992_v54, 0.0  ;;  %v1368_v54 = vadd.f32 -3.675754, %v2260_v45 }
 0x3f6   :  { %v2272_v63 = vpop.xlane.xlu0 %923 }
 0x3f7   :  { %v1024_v59 = vadd.f32 1e-06, %v1008_v27 }
 0x3f8   :  { %v1176_v11 = vpop.permute.xlu1 %1175 }
 0x3f9   :  { %1222 = vst.msk [vmem:[#allocation2 + $0x10] sm:$0xff] %vm1219_vm2, %v1176_v11  ;;  %1090 = vadd.xlane.f32.xlu1 %v1089_v53  ;;  %1195 = vrot.lane.b32.xlu0 %v1629_v13, %s1680_s27  ;;  %v974_v13 = vmul.f32 %v2195_v47, %v2195_v47  ;;  %v972_v47 = vmul.f32 %v2203_v10, %v2203_v10 }
 0x3fa   :  { %1287 = vst.msk [vmem:[#allocation2 + $0x10] sm:$0xff] %vm1284_vm3, %v2007_v16  ;;  %v1174_v22 = vpop.permute.xlu0 %1173  ;;  %v978_v10 = vmul.f32 %v2221_v39, %v2221_v39  ;;  %v2406_v39 = vld [vmem:[#allocation10_spill] sm:$0xff] }
 0x3fb   :  { %1221 = vst.msk [vmem:[#allocation2 + $0x8] sm:$0xff] %vm1219_vm2, %v1174_v22  ;;  %v990_v17 = vsub.f32 1.0, %v974_v13  ;;  %v988_v41 = vsub.f32 1.0, %v972_v47  ;;  %v2409_v22 = vld [vmem:[#allocation6_spill] sm:$0xff]  ;;  %v1363_v47 = vadd.f32 -3.675754, %v2245_v6 }
 0x3fc   :  { %1286 = vst.msk [vmem:[#allocation2 + $0x8] sm:$0xff] %vm1284_vm3, %v2031_v42  ;;  %v1172_v49 = vpop.permute.xlu1 %1171  ;;  %v994_v29 = vsub.f32 1.0, %v978_v10  ;;  %v2410_v10 = vld [vmem:[#allocation5_spill] sm:$0xff] }
 0x3fd   :  { %1220 = vst.msk [vmem:[#allocation2] sm:$0xff] %vm1219_vm2, %v1172_v49  ;;  %1084 = vadd.xlane.f32.xlu1 %v1083_v61  ;;  %v1006_v30 = vmax.f32 %v990_v17, 0.0  ;;  %v1004_v32 = vmax.f32 %v988_v41, 0.0  ;;  %v1080_v49 = vsel %vm882_vm1, %v1042_v43, 0.0  ;;  %v1038_v61 = vmul.f32 0.6931472, %v1645_v35 }
 0x3fe   :  { %1285 = vst.msk [vmem:[#allocation2] sm:$0xff] %vm1284_vm3, %v2027_v36  ;;  %v1184_v16 = vpop.permute.xlu0 %1183  ;;  %v1010_v38 = vmax.f32 %v994_v29, 0.0  ;;  %v1366_v29 = vadd.f32 -3.675754, %v2247_v34  ;;  %v1365_v35 = vadd.f32 -3.675754, %v2254_v44 }
 0x3ff   :  { %1226 = vst.msk [vmem:[#allocation2 + $0x30] sm:$0xff] %vm1219_vm2, %v1184_v16  ;;  %v1022_v48 = vadd.f32 1e-06, %v1006_v30  ;;  %v1020_v21 = vadd.f32 1e-06, %v1004_v32  ;;  %v1074_v9 = vsel %vm882_vm1, %v1038_v61, 0.0 }
 0x400   :  { %1291 = vst.msk [vmem:[#allocation2 + $0x30] sm:$0xff] %vm1284_vm3, %v2048_v60  ;;  %v1178_v42 = vpop.permute.xlu1 %1177  ;;  %v1026_v53 = vadd.f32 1e-06, %v1010_v38  ;;  %v1369_v61 = vadd.f32 -3.675754, %v2262_v15 }
 0x401   :  { %1223 = vst.msk [vmem:[#allocation2 + $0x18] sm:$0xff] %vm1219_vm2, %v1178_v42  ;;  %1102 = vadd.xlane.f32.xlu1 %v1101_v58  ;;  %1646 = vlog2.f32 %v1022_v48  ;;  %v1374_v15 = vadd.f32 -3.675754, %v2264_v18 }
 0x402   :  { %1288 = vst.msk [vmem:[#allocation2 + $0x18] sm:$0xff] %vm1284_vm3, %v2010_v19  ;;  %v1180_v36 = vpop.permute.xlu0 %1179  ;;  %1648 = vlog2.f32 %v1020_v21 }
 0x403   :  { %1224 = vst.msk [vmem:[#allocation2 + $0x20] sm:$0xff] %vm1219_vm2, %v1180_v36  ;;  %1650 = vlog2.f32 %v1026_v53  ;;  %v1367_v53 = vadd.f32 -3.675754, %v2249_v0 }
 0x404   :  { %1289 = vst.msk [vmem:[#allocation2 + $0x20] sm:$0xff] %vm1284_vm3, %v2056_v14  ;;  %v1186_v60 = vpop.permute.xlu1 %1185  ;;  %v2404_v14 = vld [vmem:[#allocation8_spill] sm:$0xff]  ;;  %1652 = vlog2.f32 %v1024_v59  ;;  %v1371_v59 = vadd.f32 -3.675754, %v2258_v20 }
 0x405   :  { %1227 = vst.msk [vmem:[#allocation2 + $0x38] sm:$0xff] %vm1219_vm2, %v1186_v60  ;;  %1096 = vadd.xlane.f32.xlu1 %v1095_v23 }
 0x406   :  { %1292 = vst.msk [vmem:[#allocation2 + $0x38] sm:$0xff] %vm1284_vm3, %v2052_v1  ;;  %v1192_v19 = vpop.permute.xlu0 %1191 }
 0x407   :  { %1230 = vst.msk [vmem:[#allocation2 + $0x50] sm:$0xff] %vm1219_vm2, %v1192_v19  ;;  %v1362_v19 = vadd.f32 -3.675754, %v2235_v25  ;;  %v1361_v25 = vadd.f32 -3.675754, %v2243_v55 }
 0x408   :  { %1295 = vst.msk [vmem:[#allocation2 + $0x50] sm:$0xff] %vm1284_vm3, %v2404_v14  ;;  %v1182_v46 = vpop.permute.xlu1 %1181  ;;  %v1360_v14 = vadd.f32 -3.675754, %v2239_v12 }
 0x409   :  { %1225 = vst.msk [vmem:[#allocation2 + $0x28] sm:$0xff] %vm1219_vm2, %v1182_v46 }
 0x40a   :  { %1290 = vst.msk [vmem:[#allocation2 + $0x28] sm:$0xff] %vm1284_vm3, %v2405_v26  ;;  %v1188_v1 = vpop.permute.xlu0 %1187 }
 0x40b   :  { %1228 = vst.msk [vmem:[#allocation2 + $0x40] sm:$0xff] %vm1219_vm2, %v1188_v1  ;;  %v1647_v5 = vpop.eup %1646 }
 0x40c   :  { %1293 = vst.msk [vmem:[#allocation2 + $0x40] sm:$0xff] %vm1284_vm3, %v2406_v39  ;;  %v1194_v24 = vpop.permute.xlu1 %1193  ;;  %v1050_v37 = vmul.f32 0.6931472, %v1647_v5  ;;  %v1649_v16 = vpop.eup %1648 }
 0x40d   :  { %1231 = vst.msk [vmem:[#allocation2 + $0x58] sm:$0xff] %vm1219_vm2, %v1194_v24  ;;  %v1046_v13 = vmul.f32 0.6931472, %v1649_v16  ;;  %v1651_v42 = vpop.eup %1650  ;;  %v1364_v24 = vadd.f32 -3.675754, %v2252_v8 }
 0x40e   :  { %1296 = vst.msk [vmem:[#allocation2 + $0x58] sm:$0xff] %vm1284_vm3, %v2407_v31  ;;  %v1092_v4 = vsel %vm882_vm1, %v1050_v37, 0.0  ;;  %v1058_v2 = vmul.f32 0.6931472, %v1651_v42  ;;  %v1653_v3 = vpop.eup %1652  ;;  %v1370_v31 = vadd.f32 -3.675754, %v2256_v33 }
 0x40f   :  { %v1086_v58 = vsel %vm882_vm1, %v1046_v13, 0.0  ;;  %v1054_v40 = vmul.f32 0.6931472, %v1653_v3  ;;  %v1372_v8 = vadd.f32 -3.675754, %v2269_v50 }
 0x410   :  { %v1190_v11 = vpop.permute.xlu1 %1189  ;;  %v1104_v36 = vsel %vm882_vm1, %v1058_v2, 0.0  ;;  %v1373_v16 = vadd.f32 -3.675754, %v2272_v63 }
 0x411   :  { %1229 = vst.msk [vmem:[#allocation2 + $0x48] sm:$0xff] %vm1219_vm2, %v1190_v11  ;;  %v1098_v17 = vsel %vm882_vm1, %v1054_v40, 0.0 }
 0x412   :  { %1294 = vst.msk [vmem:[#allocation2 + $0x48] sm:$0xff] %vm1284_vm3, %v2408_v51 }
 0x416   :  { %1266 = vrot.lane.b32.xlu1 %v2409_v22, %s1680_s27 }
 0x418   :  { %1081 = vadd.xlane.f32.xlu0 %v1080_v49 }
 0x41c   :  { %1075 = vadd.xlane.f32.xlu0 %v1074_v9  ;;  %v1375_v9 = vadd.f32 -3.675754, %v2267_v57 }
 0x420   :  { %1093 = vadd.xlane.f32.xlu0 %v1092_v4 }
 0x424   :  { %1087 = vadd.xlane.f32.xlu0 %v1086_v58 }
 0x428   :  { %1105 = vadd.xlane.f32.xlu0 %v1104_v36 }
 0x42c   :  { %1099 = vadd.xlane.f32.xlu0 %v1098_v17 }
 0x43b   :  { %v1070_v60 = vpop.xlane.xlu0 %1069 }
 0x43c   :  { %v1110_v23 = vsub.f32 %v1363_v47, %v1070_v60 }
 0x43e   :  { %1305 = vst.msk [vmem:[#allocation2 + $0x18] sm:$0xff] %vm1301_vm4, %v1110_v23 }
 0x43f   :  { %v1200_v7 = vpop.permute.xlu0 %1199 }
 0x440   :  { %1234 = vst.msk [vmem:[#allocation2 + $0x70] sm:$0xff] %vm1219_vm2, %v1200_v7 }
 0x441   :  { %v1067_v30 = vpop.xlane.xlu1 %1066 }
 0x442   :  { %v1109_v41 = vsub.f32 %v1362_v19, %v1067_v30  ;;  %1264 = vrot.lane.b32.xlu0 %v2410_v10, %s1680_s27  ;;  %s1323_s27 = sshll.u32 %s1681_s1, 4  ;;  %s1324_s27 = int_to_ptr.vmem [resolvable:$true] %s1323_s27 }
 0x443   :  { %s1654_s5 = scalar_lea.vmem %s1324_s27, 2048  ;;  %p1659_p1 = scmp.lt.s32.totalorder %s1324_s27, %s1324_s27 }
 0x444   :  { %1304 = vst.msk [vmem:[#allocation2 + $0x10] sm:$0xff] %vm1301_vm4, %v1109_v41  ;;  %p1655_p0 = scmp.ne.s32.totalorder %s1324_s27, %s1654_s5  ;;  %p1660_p2 = scmp.lt.s32.totalorder %s1654_s5, %s1654_s5 }
 0x445   :  { %v1061_v6 = vpop.xlane.xlu1 %1060 }
 0x446   :  { %v1107_v46 = vsub.f32 %v1360_v14, %v1061_v6  ;;  %p1661_p3 = por %p1660_p2, %p1659_p1 }
 0x448   :  { %1302 = vst.msk [vmem:[#allocation2] sm:$0xff] %vm1301_vm4, %v1107_v46  ;;  %p1662_p4 = pnand %p1661_p3, %p1655_p0 }
 0x449   :  { %v1202_v26 = vpop.permute.xlu1 %1201 }
 0x44a   :  { %1235 = vst.msk [vmem:[#allocation2 + $0x78] sm:$0xff] %vm1219_vm2, %v1202_v26 }
 0x44d   :  { %v1198_v1 = vpop.permute.xlu1 %1197 }
 0x44e   :  { %1233 = vst.msk [vmem:[#allocation2 + $0x68] sm:$0xff] %vm1219_vm2, %v1198_v1 }
 0x44f   :  { %1298 = vst.msk [vmem:[#allocation2 + $0x68] sm:$0xff] %vm1284_vm3, %v2150_v62 }
 0x470   :  { %v1064_v48 = vpop.xlane.xlu0 %1063 }
 0x471   :  { %v1108_v32 = vsub.f32 %v1361_v25, %v1064_v48 }
 0x473   :  { %1303 = vst.msk [vmem:[#allocation2 + $0x8] sm:$0xff] %vm1301_vm4, %v1108_v32 }
 0x474   :  { %v1196_v12 = vpop.permute.xlu0 %1195 }
 0x475   :  { %1232 = vst.msk [vmem:[#allocation2 + $0x60] sm:$0xff] %vm1219_vm2, %v1196_v12 }
 0x476   :  { %1297 = vst.msk [vmem:[#allocation2 + $0x60] sm:$0xff] %vm1284_vm3, %v2148_v28 }
 0x47e   :  { %v1079_v52 = vpop.xlane.xlu1 %1078 }
 0x47f   :  { %v1113_v39 = vsub.f32 %v1366_v29, %v1079_v52 }
 0x481   :  { %1308 = vst.msk [vmem:[#allocation2 + $0x30] sm:$0xff] %vm1301_vm4, %v1113_v39 }
 0x482   :  { %v1073_v62 = vpop.xlane.xlu1 %1072 }
 0x483   :  { %v1111_v55 = vsub.f32 %v1364_v24, %v1073_v62 }
 0x485   :  { %1306 = vst.msk [vmem:[#allocation2 + $0x20] sm:$0xff] %vm1301_vm4, %v1111_v55 }
 0x486   :  { %v1091_v21 = vpop.xlane.xlu1 %1090 }
 0x487   :  { %v1117_v38 = vsub.f32 %v1370_v31, %v1091_v21 }
 0x489   :  { %1312 = vst.msk [vmem:[#allocation2 + $0x50] sm:$0xff] %vm1301_vm4, %v1117_v38 }
 0x48a   :  { %v1085_v28 = vpop.xlane.xlu1 %1084 }
 0x48b   :  { %v1115_v34 = vsub.f32 %v1368_v54, %v1085_v28 }
 0x48d   :  { %1310 = vst.msk [vmem:[#allocation2 + $0x40] sm:$0xff] %vm1301_vm4, %v1115_v34 }
 0x48e   :  { %v1103_v56 = vpop.xlane.xlu1 %1102 }
 0x48f   :  { %v1121_v13 = vsub.f32 %v1374_v15, %v1103_v56 }
 0x492   :  { %v1097_v11 = vpop.xlane.xlu1 %1096 }
 0x493   :  { %v1119_v51 = vsub.f32 %v1372_v8, %v1097_v11 }
 0x495   :  { %1314 = vst.msk [vmem:[#allocation2 + $0x60] sm:$0xff] %vm1301_vm4, %v1119_v51 }
 0x496   :  { %v1267_v33 = vpop.permute.xlu1 %1266 }
 0x497   :  { %1300 = vst.msk [vmem:[#allocation2 + $0x78] sm:$0xff] %vm1284_vm3, %v1267_v33 }
 0x4a5   :  { %v1082_v27 = vpop.xlane.xlu0 %1081 }
 0x4a6   :  { %v1114_v45 = vsub.f32 %v1367_v53, %v1082_v27 }
 0x4a8   :  { %1309 = vst.msk [vmem:[#allocation2 + $0x38] sm:$0xff] %vm1301_vm4, %v1114_v45 }
 0x4a9   :  { %v1076_v43 = vpop.xlane.xlu0 %1075 }
 0x4aa   :  { %v1112_v22 = vsub.f32 %v1365_v35, %v1076_v43 }
 0x4ac   :  { %1307 = vst.msk [vmem:[#allocation2 + $0x28] sm:$0xff] %vm1301_vm4, %v1112_v22 }
 0x4ad   :  { %v1094_v50 = vpop.xlane.xlu0 %1093 }
 0x4ae   :  { %v1118_v49 = vsub.f32 %v1371_v59, %v1094_v50 }
 0x4b0   :  { %1313 = vst.msk [vmem:[#allocation2 + $0x58] sm:$0xff] %vm1301_vm4, %v1118_v49 }
 0x4b1   :  { %v1088_v5 = vpop.xlane.xlu0 %1087 }
 0x4b2   :  { %v1116_v0 = vsub.f32 %v1369_v61, %v1088_v5 }
 0x4b4   :  { %1311 = vst.msk [vmem:[#allocation2 + $0x48] sm:$0xff] %vm1301_vm4, %v1116_v0 }
 0x4b5   :  { %v1106_v44 = vpop.xlane.xlu0 %1105 }
 0x4b6   :  { %v1122_v37 = vsub.f32 %v1375_v9, %v1106_v44 }
 0x4b8   :  { %1317 = vst.msk [vmem:[#allocation2 + $0x78] sm:$0xff] %vm1301_vm4, %v1122_v37 }
 0x4b9   :  { %v1100_v20 = vpop.xlane.xlu0 %1099 }
 0x4ba   :  { %v1120_v4 = vsub.f32 %v1373_v16, %v1100_v20 }
 0x4bc   :  { %1315 = vst.msk [vmem:[#allocation2 + $0x68] sm:$0xff] %vm1301_vm4, %v1120_v4 }
 0x4bd   :  { %v1265_v42 = vpop.permute.xlu0 %1264 }
 0x4be   :  { %1299 = vst.msk [vmem:[#allocation2 + $0x70] sm:$0xff] %vm1284_vm3, %v1265_v42 }
 0x4bf   :  { %1316 = vst.msk [vmem:[#allocation2 + $0x70] sm:$0xff] %vm1301_vm4, %v1121_v13 }
 0x4c0   :  { %1665 = shalt.err (!%p1662_p4)
}
 0x4c1   :  { %s1666_s8 = scalar_lea.hbm %s2394_s3, 2048 }
 0x4c2   :  { %p1667_p5 = scmp.ne.s32.totalorder %s2394_s3, %s1666_s8  ;;  %p1670_p6 = scmp.lt.u32.totalorder %s1666_s8, %s2394_s3 }
 0x4c4   :  { %p1672_p7 = pnand %p1670_p6, %p1667_p5 }
 0x4c6   :  { %1675 = shalt.err (!%p1672_p7)
}
 0x4c7   :  { %s1682_s12 = smov 128   ;;  %s1683_s13 = smov 8  }
 0x4c8   :  { %1329 = dma.vmem_to_hbm [thread:$0]  %s1324_s27, 2048, %s2394_s3, [#allocation3], %s1682_s12, %s1682_s12, %s1683_s13  }
 0x4c9   :  { %1676 = dma.done.wait [#allocation3], 2048  }
 0x4ca   :  { %1677 = vsyncadd [#allocation3], 4294965248 }
 0x4cb   :  { %1333 = vsyncpa [#allocation3], 1 }

</bundles_post_ra>
